<compile_context>
chip_gen: v6e
topology: v6e:2x2x1
jax: 0.10.0
libtpu: 0.0.40
codegen_flags: <defaults>
</compile_context>

<pallas_src>
import functools

import jax
import jax.numpy as jnp
from jax import lax
from jax.experimental import pallas as pl
from jax.experimental.pallas import tpu as pltpu


# ----------------------------------------------------------------------------
# Single fused kernel: one grid step == `nb` batch elements (default: all).
# ----------------------------------------------------------------------------
def _fused_layer_kernel(
    tgt_ref, mem_ref,
    sa_wq_ref, sa_wk_ref, sa_wv_ref, sa_bq_ref, sa_bk_ref, sa_bv_ref,
    sa_wo_ref, sa_bo_ref,
    ca_wq_ref, ca_wk_ref, ca_wv_ref, ca_bq_ref, ca_bk_ref, ca_bv_ref,
    ca_wo_ref, ca_bo_ref,
    w1_ref, b1_ref, w2_ref, b2_ref,
    g1_ref, be1_ref, g2_ref, be2_ref, g3_ref, be3_ref,
    hmask_ref,
    out_ref,
    *, nb, l_tgt, l_mem, nhead, eps,
):
    E = tgt_ref.shape[-1]
    f32 = jnp.float32
    L, Lm, H = l_tgt, l_mem, nhead

    x = tgt_ref[...].astype(f32)        # (nb*L,  E) flattened tgt rows
    mem = mem_ref[...].astype(f32)      # (nb*Lm, E) flattened memory rows
    hmask = hmask_ref[...]              # (H, 1, E) head-column mask (0/1 f32)

    def layer_norm(y, g, b):
        # single-pass stats: E[x], E[x^2]  (two independent lane reductions)
        mu = jnp.mean(y, axis=-1, keepdims=True)
        ms = jnp.mean(y * y, axis=-1, keepdims=True)
        var = ms - mu * mu
        return (y - mu) * lax.rsqrt(var + eps) * g + b

    def mha_one(q, k, v, wo, bo):
        # q: (Lq, E) with the 1/sqrt(Dh) scale pre-folded into the q projection.
        # All-head scores in ONE matmul: stack head-masked copies of q along the
        # sublane axis -> (H*Lq, E), contract the full E axis against k.
        # No lane-offset slices; the only per-head op is an elementwise mask.
        Lq, Lk = q.shape[0], k.shape[0]
        q_big = (jnp.broadcast_to(q[None], (H, Lq, E)) * hmask).reshape(H * Lq, E)
        s = lax.dot_general(q_big, k, (((1,), (1,)), ((), ())),
                            preferred_element_type=f32)              # (H*Lq, Lk)
        s = s - jnp.max(s, axis=-1, keepdims=True)
        p = jnp.exp(s)
        p = p * pl.reciprocal(jnp.sum(p, axis=-1, keepdims=True), approx=True)
        o_all = jnp.dot(p, v, preferred_element_type=f32)             # (H*Lq, E)
        # head-concat = pick head-h columns from head-h row block (mask + sum)
        o = jnp.sum(o_all.reshape(H, Lq, E) * hmask, axis=0)          # (Lq, E)
        return jnp.dot(o, wo, preferred_element_type=f32) + bo

    # ---------------- self-attention (projections over the whole batch) -------
    q_s = jnp.dot(x, sa_wq_ref[...], preferred_element_type=f32) + sa_bq_ref[...]
    k_s = jnp.dot(x, sa_wk_ref[...], preferred_element_type=f32) + sa_bk_ref[...]
    v_s = jnp.dot(x, sa_wv_ref[...], preferred_element_type=f32) + sa_bv_ref[...]

    blocks = []
    for b in range(nb):                                   # static unroll, nb small
        r = slice(b * L, (b + 1) * L)                      # sublane-aligned (L=8)
        blocks.append(mha_one(q_s[r], k_s[r], v_s[r], sa_wo_ref[...], sa_bo_ref[...]))
    self_feat = blocks[0] if nb == 1 else jnp.concatenate(blocks, axis=0)

    t = layer_norm(x + self_feat, g1_ref[...], be1_ref[...])

    # ---------------- cross-attention ----------------
    q_c = jnp.dot(t, ca_wq_ref[...], preferred_element_type=f32) + ca_bq_ref[...]
    k_c = jnp.dot(mem, ca_wk_ref[...], preferred_element_type=f32) + ca_bk_ref[...]
    v_c = jnp.dot(mem, ca_wv_ref[...], preferred_element_type=f32) + ca_bv_ref[...]

    blocks = []
    for b in range(nb):
        rq = slice(b * L, (b + 1) * L)
        rk = slice(b * Lm, (b + 1) * Lm)
        blocks.append(mha_one(q_c[rq], k_c[rk], v_c[rk], ca_wo_ref[...], ca_bo_ref[...]))
    cross_feat = blocks[0] if nb == 1 else jnp.concatenate(blocks, axis=0)

    t = layer_norm(t + cross_feat, g2_ref[...], be2_ref[...])

    # ---------------- feed-forward ----------------
    h1 = jnp.maximum(jnp.dot(t, w1_ref[...], preferred_element_type=f32) + b1_ref[...], 0.0)
    ff = jnp.dot(h1, w2_ref[...], preferred_element_type=f32) + b2_ref[...]
    t = layer_norm(t + ff, g3_ref[...], be3_ref[...])

    # ---------------- one merged writeback: [final, self_feat, cross_feat] ----
    out_ref[0] = t.astype(out_ref.dtype)
    out_ref[1] = self_feat.astype(out_ref.dtype)
    out_ref[2] = cross_feat.astype(out_ref.dtype)


# ----------------------------------------------------------------------------
# One-time weight packing: transposes, scale folding, head mask. Call ONCE,
# outside the jitted forward, so none of this is re-executed per call.
# ----------------------------------------------------------------------------
def prepare_params(params, nhead):
    E = params["norm1_w"].shape[0]
    Dh = E // nhead
    scale = 1.0 / (Dh ** 0.5)

    def split_in_proj(w, b):
        # torch MultiheadAttention: in_proj_weight (3E, E), in_proj_bias (3E,).
        wq = (w[:E] * scale).T                 # fold 1/sqrt(Dh) into Q
        wk = w[E:2 * E].T
        wv = w[2 * E:].T
        bq = (b[:E] * scale).reshape(1, E)
        bk = b[E:2 * E].reshape(1, E)
        bv = b[2 * E:].reshape(1, E)
        return wq, wk, wv, bq, bk, bv

    sa, ca = params["self_attn"], params["cross_attn"]
    sa_w = split_in_proj(sa["in_proj_weight"], sa["in_proj_bias"])
    ca_w = split_in_proj(ca["in_proj_weight"], ca["in_proj_bias"])

    sa_wo = sa["out_proj_weight"].T
    sa_bo = sa["out_proj_bias"].reshape(1, E)
    ca_wo = ca["out_proj_weight"].T
    ca_bo = ca["out_proj_bias"].reshape(1, E)

    w1 = params["linear1_w"].T
    b1 = params["linear1_b"].reshape(1, -1)
    w2 = params["linear2_w"].T
    b2 = params["linear2_b"].reshape(1, -1)
    g1 = params["norm1_w"].reshape(1, E); be1 = params["norm1_b"].reshape(1, E)
    g2 = params["norm2_w"].reshape(1, E); be2 = params["norm2_b"].reshape(1, E)
    g3 = params["norm3_w"].reshape(1, E); be3 = params["norm3_b"].reshape(1, E)

    # head-column mask: hmask[h, 0, e] = 1.0 iff column e belongs to head h
    hmask = (jnp.arange(E)[None, :] // Dh == jnp.arange(nhead)[:, None])
    hmask = hmask.astype(jnp.float32).reshape(nhead, 1, E)

    packed = (*sa_w, sa_wo, sa_bo, *ca_w, ca_wo, ca_bo,
              w1, b1, w2, b2, g1, be1, g2, be2, g3, be3, hmask)
    return jax.tree.map(jnp.asarray, packed)


# ----------------------------------------------------------------------------
# Forward: the only per-call XLA glue is the (L,N,E) <-> flattened-rows reshape.
# ----------------------------------------------------------------------------
@functools.partial(jax.jit, static_argnames=("nhead", "eps", "batch_blocks"))
def attn_graph_layer_forward(tgt, memory, packed, *, nhead, eps=1e-5, batch_blocks=1):
    L, Nb, E = tgt.shape
    Lm = memory.shape[0]
    assert Nb % batch_blocks == 0
    nb_per = Nb // batch_blocks            # batch elements per grid step

    # (L, N, E) -> (N*L, E): rows for batch b are b*L:(b+1)*L (lane-dense rows).
    tgt_rows = jnp.transpose(tgt, (1, 0, 2)).reshape(Nb * L, E)
    mem_rows = jnp.transpose(memory, (1, 0, 2)).reshape(Nb * Lm, E)

    def whole(a):
        shp = a.shape
        return pl.BlockSpec(shp, lambda g, _n=len(shp): (0,) * _n)  # resident weights

    kernel = functools.partial(_fused_layer_kernel, nb=nb_per, l_tgt=L, l_mem=Lm,
                               nhead=nhead, eps=eps)

    merged = pl.pallas_call(
        kernel,
        grid=(batch_blocks,),
        in_specs=[pl.BlockSpec((nb_per * L, E), lambda g: (g, 0)),
                  pl.BlockSpec((nb_per * Lm, E), lambda g: (g, 0))]
                 + [whole(w) for w in packed],
        out_specs=pl.BlockSpec((3, nb_per * L, E), lambda g: (0, g, 0)),
        out_shape=jax.ShapeDtypeStruct((3, Nb * L, E), tgt.dtype),
        compiler_params=pltpu.CompilerParams(
            dimension_semantics=("parallel",),       # uses both TCs if batch_blocks=2 (v7x)
            vmem_limit_bytes=32 * 1024 * 1024),
    )(tgt_rows, mem_rows, *packed)

    def unflat(rows):
        return jnp.transpose(rows.reshape(Nb, L, E), (1, 0, 2))

    return unflat(merged[0]), unflat(merged[1]), unflat(merged[2])


# ----------------------------------------------------------------------------
# Pure-JAX reference (PyTorch semantics) for a correctness sanity check.
# ----------------------------------------------------------------------------
def _ref_mha(q_in, k_in, v_in, p, nhead):
    Lq, Nb, E = q_in.shape
    Lk = k_in.shape[0]
    Dh = E // nhead
    w, b = p["in_proj_weight"], p["in_proj_bias"]
    q = (q_in @ w[:E].T + b[:E]) * (Dh ** -0.5)
    k = k_in @ w[E:2 * E].T + b[E:2 * E]
    v = v_in @ w[2 * E:].T + b[2 * E:]

    def split(x, Ls):
        return x.reshape(Ls, Nb, nhead, Dh).transpose(1, 2, 0, 3)   # (N, H, L, Dh)

    qh, kh, vh = split(q, Lq), split(k, Lk), split(v, Lk)
    s = jnp.einsum('nhqd,nhkd->nhqk', qh, kh)
    a = jax.nn.softmax(s, axis=-1)
    o = jnp.einsum('nhqk,nhkd->nhqd', a, vh)
    o = o.transpose(2, 0, 1, 3).reshape(Lq, Nb, E)
    return o @ p["out_proj_weight"].T + p["out_proj_bias"]


def _ref_ln(x, g, b, eps=1e-5):
    mu = x.mean(-1, keepdims=True)
    var = ((x - mu) ** 2).mean(-1, keepdims=True)
    return (x - mu) / jnp.sqrt(var + eps) * g + b


def _ref_forward(tgt, memory, params, nhead, eps=1e-5):
    sf = _ref_mha(tgt, tgt, tgt, params["self_attn"], nhead)
    t = _ref_ln(tgt + sf, params["norm1_w"], params["norm1_b"], eps)
    cf = _ref_mha(t, memory, memory, params["cross_attn"], nhead)
    t = _ref_ln(t + cf, params["norm2_w"], params["norm2_b"], eps)
    h = jax.nn.relu(t @ params["linear1_w"].T + params["linear1_b"])
    ff = h @ params["linear2_w"].T + params["linear2_b"]
    t = _ref_ln(t + ff, params["norm3_w"], params["norm3_b"], eps)
    return t, sf, cf


# ----------------------------------------------------------------------------
# Deterministic parameter init (shapes follow the PyTorch module __init__).
# ----------------------------------------------------------------------------
def init_params(key, d_model, nhead, dim_feedforward):
    ks = jax.random.split(key, 14)

    def nrm(k, shape, s=0.02):
        return (s * jax.random.normal(k, shape)).astype(jnp.float32)

    def mha_params(k1, k2, k3, k4):
        return {
            "in_proj_weight": nrm(k1, (3 * d_model, d_model)),
            "in_proj_bias": nrm(k2, (3 * d_model,)),
            "out_proj_weight": nrm(k3, (d_model, d_model)),
            "out_proj_bias": nrm(k4, (d_model,)),
        }

    return {
        "self_attn": mha_params(ks[0], ks[1], ks[2], ks[3]),
        "cross_attn": mha_params(ks[4], ks[5], ks[6], ks[7]),
        "linear1_w": nrm(ks[8], (dim_feedforward, d_model)),   # (out, in) like torch
        "linear1_b": nrm(ks[9], (dim_feedforward,)),
        "linear2_w": nrm(ks[10], (d_model, dim_feedforward)),
        "linear2_b": nrm(ks[11], (d_model,)),
        "norm1_w": jnp.ones((d_model,), jnp.float32),
        "norm1_b": nrm(ks[12], (d_model,)),
        "norm2_w": jnp.ones((d_model,), jnp.float32),
        "norm2_b": nrm(ks[13], (d_model,)),
        "norm3_w": jnp.ones((d_model,), jnp.float32),
        "norm3_b": jnp.zeros((d_model,), jnp.float32),
    }


if __name__ == "__main__":
    d_model, nhead, dim_ff = 32, 4, 64
    L_tgt, L_mem, batch = 8, 12, 2

    key = jax.random.PRNGKey(0)
    k_tgt, k_mem, k_par = jax.random.split(key, 3)
    tgt = jax.random.normal(k_tgt, (L_tgt, batch, d_model), jnp.float32)
    memory = jax.random.normal(k_mem, (L_mem, batch, d_model), jnp.float32)
    params = init_params(k_par, d_model, nhead, dim_ff)

    packed = prepare_params(params, nhead)          # one-time weight packing
    packed = jax.block_until_ready(packed)

    out, self_feat, cross_feat = attn_graph_layer_forward(
        tgt, memory, packed, nhead=nhead)           # batch_blocks=2 on v7x
    jax.block_until_ready((out, self_feat, cross_feat))

    assert out.shape == (L_tgt, batch, d_model)
    assert self_feat.shape == (L_tgt, batch, d_model)
    assert cross_feat.shape == (L_tgt, batch, d_model)

    # numerical sanity check against a pure-JAX reference of the PyTorch forward
    with jax.default_matmul_precision("highest"):
        ref_out, ref_sf, ref_cf = _ref_forward(tgt, memory, params, nhead)
    for got, ref in ((out, ref_out), (self_feat, ref_sf), (cross_feat, ref_cf)):
        assert jnp.allclose(got, ref, atol=1e-2, rtol=1e-2), float(jnp.max(jnp.abs(got - ref)))

    # TODO(synk): no attn_mask / key_padding_mask path and dropout==0 only (eval
    # semantics), matching the reference module's forward as written.
    print("KERNEL_OK")
</pallas_src>

<mosaic_0001>
module attributes {stable_mosaic.version = 11 : i64} {
  func.func @_fused_layer_kernel(%arg0: i32, %arg1: memref<16x32xf32, #tpu.memory_space<vmem>>, %arg2: memref<24x32xf32, #tpu.memory_space<vmem>>, %arg3: memref<32x32xf32, #tpu.memory_space<vmem>>, %arg4: memref<32x32xf32, #tpu.memory_space<vmem>>, %arg5: memref<32x32xf32, #tpu.memory_space<vmem>>, %arg6: memref<1x32xf32, #tpu.memory_space<vmem>>, %arg7: memref<1x32xf32, #tpu.memory_space<vmem>>, %arg8: memref<1x32xf32, #tpu.memory_space<vmem>>, %arg9: memref<32x32xf32, #tpu.memory_space<vmem>>, %arg10: memref<1x32xf32, #tpu.memory_space<vmem>>, %arg11: memref<32x32xf32, #tpu.memory_space<vmem>>, %arg12: memref<32x32xf32, #tpu.memory_space<vmem>>, %arg13: memref<32x32xf32, #tpu.memory_space<vmem>>, %arg14: memref<1x32xf32, #tpu.memory_space<vmem>>, %arg15: memref<1x32xf32, #tpu.memory_space<vmem>>, %arg16: memref<1x32xf32, #tpu.memory_space<vmem>>, %arg17: memref<32x32xf32, #tpu.memory_space<vmem>>, %arg18: memref<1x32xf32, #tpu.memory_space<vmem>>, %arg19: memref<32x64xf32, #tpu.memory_space<vmem>>, %arg20: memref<1x64xf32, #tpu.memory_space<vmem>>, %arg21: memref<64x32xf32, #tpu.memory_space<vmem>>, %arg22: memref<1x32xf32, #tpu.memory_space<vmem>>, %arg23: memref<1x32xf32, #tpu.memory_space<vmem>>, %arg24: memref<1x32xf32, #tpu.memory_space<vmem>>, %arg25: memref<1x32xf32, #tpu.memory_space<vmem>>, %arg26: memref<1x32xf32, #tpu.memory_space<vmem>>, %arg27: memref<1x32xf32, #tpu.memory_space<vmem>>, %arg28: memref<1x32xf32, #tpu.memory_space<vmem>>, %arg29: memref<4x1x32xf32, #tpu.memory_space<vmem>>, %arg30: memref<3x16x32xf32, #tpu.memory_space<vmem>>) attributes {dimension_semantics = [#tpu.dimension_semantics<parallel>], iteration_bounds = array<i64: 1>, scalar_prefetch = 0 : i64, scratch_operands = 0 : i64, tpu.core_type = #tpu.core_type<tc>, window_params = [{transform_indices = @transform_0, window_bounds = array<i64: 16, 32>}, {transform_indices = @transform_1, window_bounds = array<i64: 24, 32>}, {pipeline_mode = #tpu.pipeline_mode<synchronous>, transform_indices = @transform_2, window_bounds = array<i64: 32, 32>}, {pipeline_mode = #tpu.pipeline_mode<synchronous>, transform_indices = @transform_3, window_bounds = array<i64: 32, 32>}, {pipeline_mode = #tpu.pipeline_mode<synchronous>, transform_indices = @transform_4, window_bounds = array<i64: 32, 32>}, {pipeline_mode = #tpu.pipeline_mode<synchronous>, transform_indices = @transform_5, window_bounds = array<i64: 1, 32>}, {pipeline_mode = #tpu.pipeline_mode<synchronous>, transform_indices = @transform_6, window_bounds = array<i64: 1, 32>}, {pipeline_mode = #tpu.pipeline_mode<synchronous>, transform_indices = @transform_7, window_bounds = array<i64: 1, 32>}, {pipeline_mode = #tpu.pipeline_mode<synchronous>, transform_indices = @transform_8, window_bounds = array<i64: 32, 32>}, {pipeline_mode = #tpu.pipeline_mode<synchronous>, transform_indices = @transform_9, window_bounds = array<i64: 1, 32>}, {pipeline_mode = #tpu.pipeline_mode<synchronous>, transform_indices = @transform_10, window_bounds = array<i64: 32, 32>}, {pipeline_mode = #tpu.pipeline_mode<synchronous>, transform_indices = @transform_11, window_bounds = array<i64: 32, 32>}, {pipeline_mode = #tpu.pipeline_mode<synchronous>, transform_indices = @transform_12, window_bounds = array<i64: 32, 32>}, {pipeline_mode = #tpu.pipeline_mode<synchronous>, transform_indices = @transform_13, window_bounds = array<i64: 1, 32>}, {pipeline_mode = #tpu.pipeline_mode<synchronous>, transform_indices = @transform_14, window_bounds = array<i64: 1, 32>}, {pipeline_mode = #tpu.pipeline_mode<synchronous>, transform_indices = @transform_15, window_bounds = array<i64: 1, 32>}, {pipeline_mode = #tpu.pipeline_mode<synchronous>, transform_indices = @transform_16, window_bounds = array<i64: 32, 32>}, {pipeline_mode = #tpu.pipeline_mode<synchronous>, transform_indices = @transform_17, window_bounds = array<i64: 1, 32>}, {pipeline_mode = #tpu.pipeline_mode<synchronous>, transform_indices = @transform_18, window_bounds = array<i64: 32, 64>}, {pipeline_mode = #tpu.pipeline_mode<synchronous>, transform_indices = @transform_19, window_bounds = array<i64: 1, 64>}, {pipeline_mode = #tpu.pipeline_mode<synchronous>, transform_indices = @transform_20, window_bounds = array<i64: 64, 32>}, {pipeline_mode = #tpu.pipeline_mode<synchronous>, transform_indices = @transform_21, window_bounds = array<i64: 1, 32>}, {pipeline_mode = #tpu.pipeline_mode<synchronous>, transform_indices = @transform_22, window_bounds = array<i64: 1, 32>}, {pipeline_mode = #tpu.pipeline_mode<synchronous>, transform_indices = @transform_23, window_bounds = array<i64: 1, 32>}, {pipeline_mode = #tpu.pipeline_mode<synchronous>, transform_indices = @transform_24, window_bounds = array<i64: 1, 32>}, {pipeline_mode = #tpu.pipeline_mode<synchronous>, transform_indices = @transform_25, window_bounds = array<i64: 1, 32>}, {pipeline_mode = #tpu.pipeline_mode<synchronous>, transform_indices = @transform_26, window_bounds = array<i64: 1, 32>}, {pipeline_mode = #tpu.pipeline_mode<synchronous>, transform_indices = @transform_27, window_bounds = array<i64: 1, 32>}, {pipeline_mode = #tpu.pipeline_mode<synchronous>, transform_indices = @transform_28, window_bounds = array<i64: 4, 1, 32>}, {transform_indices = @transform_29, window_bounds = array<i64: 3, 16, 32>}]} {
    %c0 = arith.constant 0 : index
    %c0_0 = arith.constant 0 : index
    %0 = vector.load %arg1[%c0, %c0_0] : memref<16x32xf32, #tpu.memory_space<vmem>>, vector<16x32xf32>
    %c0_1 = arith.constant 0 : index
    %c0_2 = arith.constant 0 : index
    %1 = vector.load %arg2[%c0_1, %c0_2] : memref<24x32xf32, #tpu.memory_space<vmem>>, vector<24x32xf32>
    %c0_3 = arith.constant 0 : index
    %c0_4 = arith.constant 0 : index
    %c0_5 = arith.constant 0 : index
    %2 = vector.load %arg29[%c0_3, %c0_4, %c0_5] : memref<4x1x32xf32, #tpu.memory_space<vmem>>, vector<4x1x32xf32>
    %c0_6 = arith.constant 0 : index
    %c0_7 = arith.constant 0 : index
    %3 = vector.load %arg3[%c0_6, %c0_7] : memref<32x32xf32, #tpu.memory_space<vmem>>, vector<32x32xf32>
    %cst = arith.constant dense<0.000000e+00> : vector<16x32xf32>
    %4 = tpu.matmul %0, %3, %cst {dimension_numbers = #tpu.dot_dimension_numbers<[1], [0], [0], [1], [0, 0, 1, 1], [], []>} : vector<16x32xf32>, vector<32x32xf32>, vector<16x32xf32> -> vector<16x32xf32>
    %c0_8 = arith.constant 0 : index
    %c0_9 = arith.constant 0 : index
    %5 = vector.load %arg6[%c0_8, %c0_9] : memref<1x32xf32, #tpu.memory_space<vmem>>, vector<1x32xf32>
    %6 = vector.broadcast %5 : vector<1x32xf32> to vector<16x32xf32>
    %7 = arith.addf %4, %6 : vector<16x32xf32>
    %c0_10 = arith.constant 0 : index
    %c0_11 = arith.constant 0 : index
    %8 = vector.load %arg4[%c0_10, %c0_11] : memref<32x32xf32, #tpu.memory_space<vmem>>, vector<32x32xf32>
    %cst_12 = arith.constant dense<0.000000e+00> : vector<16x32xf32>
    %9 = tpu.matmul %0, %8, %cst_12 {dimension_numbers = #tpu.dot_dimension_numbers<[1], [0], [0], [1], [0, 0, 1, 1], [], []>} : vector<16x32xf32>, vector<32x32xf32>, vector<16x32xf32> -> vector<16x32xf32>
    %c0_13 = arith.constant 0 : index
    %c0_14 = arith.constant 0 : index
    %10 = vector.load %arg7[%c0_13, %c0_14] : memref<1x32xf32, #tpu.memory_space<vmem>>, vector<1x32xf32>
    %11 = vector.broadcast %10 : vector<1x32xf32> to vector<16x32xf32>
    %12 = arith.addf %9, %11 : vector<16x32xf32>
    %c0_15 = arith.constant 0 : index
    %c0_16 = arith.constant 0 : index
    %13 = vector.load %arg5[%c0_15, %c0_16] : memref<32x32xf32, #tpu.memory_space<vmem>>, vector<32x32xf32>
    %cst_17 = arith.constant dense<0.000000e+00> : vector<16x32xf32>
    %14 = tpu.matmul %0, %13, %cst_17 {dimension_numbers = #tpu.dot_dimension_numbers<[1], [0], [0], [1], [0, 0, 1, 1], [], []>} : vector<16x32xf32>, vector<32x32xf32>, vector<16x32xf32> -> vector<16x32xf32>
    %c0_18 = arith.constant 0 : index
    %c0_19 = arith.constant 0 : index
    %15 = vector.load %arg8[%c0_18, %c0_19] : memref<1x32xf32, #tpu.memory_space<vmem>>, vector<1x32xf32>
    %16 = vector.broadcast %15 : vector<1x32xf32> to vector<16x32xf32>
    %17 = arith.addf %14, %16 : vector<16x32xf32>
    %18 = vector.extract_strided_slice %7 {offsets = [0, 0], sizes = [8, 32], strides = [1, 1]} : vector<16x32xf32> to vector<8x32xf32>
    %19 = vector.extract_strided_slice %12 {offsets = [0, 0], sizes = [8, 32], strides = [1, 1]} : vector<16x32xf32> to vector<8x32xf32>
    %20 = vector.extract_strided_slice %17 {offsets = [0, 0], sizes = [8, 32], strides = [1, 1]} : vector<16x32xf32> to vector<8x32xf32>
    %c0_20 = arith.constant 0 : index
    %c0_21 = arith.constant 0 : index
    %21 = vector.load %arg9[%c0_20, %c0_21] : memref<32x32xf32, #tpu.memory_space<vmem>>, vector<32x32xf32>
    %c0_22 = arith.constant 0 : index
    %c0_23 = arith.constant 0 : index
    %22 = vector.load %arg10[%c0_22, %c0_23] : memref<1x32xf32, #tpu.memory_space<vmem>>, vector<1x32xf32>
    %23 = vector.shape_cast %18 : vector<8x32xf32> to vector<1x8x32xf32>
    %24 = vector.shape_cast %23 : vector<1x8x32xf32> to vector<1x8x32xf32>
    %25 = vector.broadcast %24 : vector<1x8x32xf32> to vector<4x8x32xf32>
    %26 = vector.broadcast %2 : vector<4x1x32xf32> to vector<4x8x32xf32>
    %27 = arith.mulf %25, %26 : vector<4x8x32xf32>
    %28 = vector.shape_cast %27 : vector<4x8x32xf32> to vector<32x32xf32>
    %cst_24 = arith.constant dense<0.000000e+00> : vector<32x8xf32>
    %29 = tpu.matmul %28, %19, %cst_24 {dimension_numbers = #tpu.dot_dimension_numbers<[1], [1], [0], [0], [0, 0, 1, 0], [], []>} : vector<32x32xf32>, vector<8x32xf32>, vector<32x8xf32> -> vector<32x8xf32>
    %cst_25 = arith.constant dense<0xFF800000> : vector<32xf32>
    %30 = vector.multi_reduction <maximumf>, %29, %cst_25 [1] : vector<32x8xf32> to vector<32xf32>
    %31 = vector.shape_cast %30 : vector<32xf32> to vector<32x1xf32>
    %32 = vector.broadcast %31 : vector<32x1xf32> to vector<32x8xf32>
    %33 = arith.subf %29, %32 : vector<32x8xf32>
    %34 = math.exp %33 : vector<32x8xf32>
    %cst_26 = arith.constant dense<0.000000e+00> : vector<32xf32>
    %35 = vector.multi_reduction <add>, %34, %cst_26 [1] : vector<32x8xf32> to vector<32xf32>
    %36 = vector.shape_cast %35 : vector<32xf32> to vector<32x1xf32>
    %37 = tpu.reciprocal %36 {approx = true} : vector<32x1xf32> -> vector<32x1xf32>
    %38 = vector.broadcast %37 : vector<32x1xf32> to vector<32x8xf32>
    %39 = arith.mulf %34, %38 : vector<32x8xf32>
    %cst_27 = arith.constant dense<0.000000e+00> : vector<32x32xf32>
    %40 = tpu.matmul %39, %20, %cst_27 {dimension_numbers = #tpu.dot_dimension_numbers<[1], [0], [0], [1], [0, 0, 1, 1], [], []>} : vector<32x8xf32>, vector<8x32xf32>, vector<32x32xf32> -> vector<32x32xf32>
    %41 = vector.shape_cast %40 : vector<32x32xf32> to vector<4x8x32xf32>
    %42 = vector.broadcast %2 : vector<4x1x32xf32> to vector<4x8x32xf32>
    %43 = arith.mulf %41, %42 : vector<4x8x32xf32>
    %cst_28 = arith.constant dense<0.000000e+00> : vector<8x32xf32>
    %44 = vector.multi_reduction <add>, %43, %cst_28 [0] : vector<4x8x32xf32> to vector<8x32xf32>
    %cst_29 = arith.constant dense<0.000000e+00> : vector<8x32xf32>
    %45 = tpu.matmul %44, %21, %cst_29 {dimension_numbers = #tpu.dot_dimension_numbers<[1], [0], [0], [1], [0, 0, 1, 1], [], []>} : vector<8x32xf32>, vector<32x32xf32>, vector<8x32xf32> -> vector<8x32xf32>
    %46 = vector.broadcast %22 : vector<1x32xf32> to vector<8x32xf32>
    %47 = arith.addf %45, %46 : vector<8x32xf32>
    %48 = vector.extract_strided_slice %7 {offsets = [8, 0], sizes = [8, 32], strides = [1, 1]} : vector<16x32xf32> to vector<8x32xf32>
    %49 = vector.extract_strided_slice %12 {offsets = [8, 0], sizes = [8, 32], strides = [1, 1]} : vector<16x32xf32> to vector<8x32xf32>
    %50 = vector.extract_strided_slice %17 {offsets = [8, 0], sizes = [8, 32], strides = [1, 1]} : vector<16x32xf32> to vector<8x32xf32>
    %c0_30 = arith.constant 0 : index
    %c0_31 = arith.constant 0 : index
    %51 = vector.load %arg9[%c0_30, %c0_31] : memref<32x32xf32, #tpu.memory_space<vmem>>, vector<32x32xf32>
    %c0_32 = arith.constant 0 : index
    %c0_33 = arith.constant 0 : index
    %52 = vector.load %arg10[%c0_32, %c0_33] : memref<1x32xf32, #tpu.memory_space<vmem>>, vector<1x32xf32>
    %53 = vector.shape_cast %48 : vector<8x32xf32> to vector<1x8x32xf32>
    %54 = vector.shape_cast %53 : vector<1x8x32xf32> to vector<1x8x32xf32>
    %55 = vector.broadcast %54 : vector<1x8x32xf32> to vector<4x8x32xf32>
    %56 = vector.broadcast %2 : vector<4x1x32xf32> to vector<4x8x32xf32>
    %57 = arith.mulf %55, %56 : vector<4x8x32xf32>
    %58 = vector.shape_cast %57 : vector<4x8x32xf32> to vector<32x32xf32>
    %cst_34 = arith.constant dense<0.000000e+00> : vector<32x8xf32>
    %59 = tpu.matmul %58, %49, %cst_34 {dimension_numbers = #tpu.dot_dimension_numbers<[1], [1], [0], [0], [0, 0, 1, 0], [], []>} : vector<32x32xf32>, vector<8x32xf32>, vector<32x8xf32> -> vector<32x8xf32>
    %cst_35 = arith.constant dense<0xFF800000> : vector<32xf32>
    %60 = vector.multi_reduction <maximumf>, %59, %cst_35 [1] : vector<32x8xf32> to vector<32xf32>
    %61 = vector.shape_cast %60 : vector<32xf32> to vector<32x1xf32>
    %62 = vector.broadcast %61 : vector<32x1xf32> to vector<32x8xf32>
    %63 = arith.subf %59, %62 : vector<32x8xf32>
    %64 = math.exp %63 : vector<32x8xf32>
    %cst_36 = arith.constant dense<0.000000e+00> : vector<32xf32>
    %65 = vector.multi_reduction <add>, %64, %cst_36 [1] : vector<32x8xf32> to vector<32xf32>
    %66 = vector.shape_cast %65 : vector<32xf32> to vector<32x1xf32>
    %67 = tpu.reciprocal %66 {approx = true} : vector<32x1xf32> -> vector<32x1xf32>
    %68 = vector.broadcast %67 : vector<32x1xf32> to vector<32x8xf32>
    %69 = arith.mulf %64, %68 : vector<32x8xf32>
    %cst_37 = arith.constant dense<0.000000e+00> : vector<32x32xf32>
    %70 = tpu.matmul %69, %50, %cst_37 {dimension_numbers = #tpu.dot_dimension_numbers<[1], [0], [0], [1], [0, 0, 1, 1], [], []>} : vector<32x8xf32>, vector<8x32xf32>, vector<32x32xf32> -> vector<32x32xf32>
    %71 = vector.shape_cast %70 : vector<32x32xf32> to vector<4x8x32xf32>
    %72 = vector.broadcast %2 : vector<4x1x32xf32> to vector<4x8x32xf32>
    %73 = arith.mulf %71, %72 : vector<4x8x32xf32>
    %cst_38 = arith.constant dense<0.000000e+00> : vector<8x32xf32>
    %74 = vector.multi_reduction <add>, %73, %cst_38 [0] : vector<4x8x32xf32> to vector<8x32xf32>
    %cst_39 = arith.constant dense<0.000000e+00> : vector<8x32xf32>
    %75 = tpu.matmul %74, %51, %cst_39 {dimension_numbers = #tpu.dot_dimension_numbers<[1], [0], [0], [1], [0, 0, 1, 1], [], []>} : vector<8x32xf32>, vector<32x32xf32>, vector<8x32xf32> -> vector<8x32xf32>
    %76 = vector.broadcast %52 : vector<1x32xf32> to vector<8x32xf32>
    %77 = arith.addf %75, %76 : vector<8x32xf32>
    %78 = tpu.concatenate %47, %77 in 0 : vector<8x32xf32>, vector<8x32xf32> -> vector<16x32xf32>
    %79 = arith.addf %0, %78 : vector<16x32xf32>
    %c0_40 = arith.constant 0 : index
    %c0_41 = arith.constant 0 : index
    %80 = vector.load %arg23[%c0_40, %c0_41] : memref<1x32xf32, #tpu.memory_space<vmem>>, vector<1x32xf32>
    %c0_42 = arith.constant 0 : index
    %c0_43 = arith.constant 0 : index
    %81 = vector.load %arg24[%c0_42, %c0_43] : memref<1x32xf32, #tpu.memory_space<vmem>>, vector<1x32xf32>
    %cst_44 = arith.constant dense<0.000000e+00> : vector<16xf32>
    %82 = vector.multi_reduction <add>, %79, %cst_44 [1] : vector<16x32xf32> to vector<16xf32>
    %83 = vector.shape_cast %82 : vector<16xf32> to vector<16x1xf32>
    %cst_45 = arith.constant 3.200000e+01 : f32
    %84 = vector.broadcast %cst_45 : f32 to vector<16x1xf32>
    %85 = arith.divf %83, %84 : vector<16x1xf32>
    %86 = arith.mulf %79, %79 : vector<16x32xf32>
    %cst_46 = arith.constant dense<0.000000e+00> : vector<16xf32>
    %87 = vector.multi_reduction <add>, %86, %cst_46 [1] : vector<16x32xf32> to vector<16xf32>
    %88 = vector.shape_cast %87 : vector<16xf32> to vector<16x1xf32>
    %cst_47 = arith.constant 3.200000e+01 : f32
    %89 = vector.broadcast %cst_47 : f32 to vector<16x1xf32>
    %90 = arith.divf %88, %89 : vector<16x1xf32>
    %91 = arith.mulf %85, %85 : vector<16x1xf32>
    %92 = arith.subf %90, %91 : vector<16x1xf32>
    %93 = vector.broadcast %85 : vector<16x1xf32> to vector<16x32xf32>
    %94 = arith.subf %79, %93 : vector<16x32xf32>
    %cst_48 = arith.constant 9.99999974E-6 : f32
    %95 = vector.broadcast %cst_48 : f32 to vector<16x1xf32>
    %96 = arith.addf %92, %95 : vector<16x1xf32>
    %97 = math.rsqrt %96 : vector<16x1xf32>
    %98 = vector.broadcast %97 : vector<16x1xf32> to vector<16x32xf32>
    %99 = arith.mulf %94, %98 : vector<16x32xf32>
    %100 = vector.broadcast %80 : vector<1x32xf32> to vector<16x32xf32>
    %101 = arith.mulf %99, %100 : vector<16x32xf32>
    %102 = vector.broadcast %81 : vector<1x32xf32> to vector<16x32xf32>
    %103 = arith.addf %101, %102 : vector<16x32xf32>
    %c0_49 = arith.constant 0 : index
    %c0_50 = arith.constant 0 : index
    %104 = vector.load %arg11[%c0_49, %c0_50] : memref<32x32xf32, #tpu.memory_space<vmem>>, vector<32x32xf32>
    %cst_51 = arith.constant dense<0.000000e+00> : vector<16x32xf32>
    %105 = tpu.matmul %103, %104, %cst_51 {dimension_numbers = #tpu.dot_dimension_numbers<[1], [0], [0], [1], [0, 0, 1, 1], [], []>} : vector<16x32xf32>, vector<32x32xf32>, vector<16x32xf32> -> vector<16x32xf32>
    %c0_52 = arith.constant 0 : index
    %c0_53 = arith.constant 0 : index
    %106 = vector.load %arg14[%c0_52, %c0_53] : memref<1x32xf32, #tpu.memory_space<vmem>>, vector<1x32xf32>
    %107 = vector.broadcast %106 : vector<1x32xf32> to vector<16x32xf32>
    %108 = arith.addf %105, %107 : vector<16x32xf32>
    %c0_54 = arith.constant 0 : index
    %c0_55 = arith.constant 0 : index
    %109 = vector.load %arg12[%c0_54, %c0_55] : memref<32x32xf32, #tpu.memory_space<vmem>>, vector<32x32xf32>
    %cst_56 = arith.constant dense<0.000000e+00> : vector<24x32xf32>
    %110 = tpu.matmul %1, %109, %cst_56 {dimension_numbers = #tpu.dot_dimension_numbers<[1], [0], [0], [1], [0, 0, 1, 1], [], []>} : vector<24x32xf32>, vector<32x32xf32>, vector<24x32xf32> -> vector<24x32xf32>
    %c0_57 = arith.constant 0 : index
    %c0_58 = arith.constant 0 : index
    %111 = vector.load %arg15[%c0_57, %c0_58] : memref<1x32xf32, #tpu.memory_space<vmem>>, vector<1x32xf32>
    %112 = vector.broadcast %111 : vector<1x32xf32> to vector<24x32xf32>
    %113 = arith.addf %110, %112 : vector<24x32xf32>
    %c0_59 = arith.constant 0 : index
    %c0_60 = arith.constant 0 : index
    %114 = vector.load %arg13[%c0_59, %c0_60] : memref<32x32xf32, #tpu.memory_space<vmem>>, vector<32x32xf32>
    %cst_61 = arith.constant dense<0.000000e+00> : vector<24x32xf32>
    %115 = tpu.matmul %1, %114, %cst_61 {dimension_numbers = #tpu.dot_dimension_numbers<[1], [0], [0], [1], [0, 0, 1, 1], [], []>} : vector<24x32xf32>, vector<32x32xf32>, vector<24x32xf32> -> vector<24x32xf32>
    %c0_62 = arith.constant 0 : index
    %c0_63 = arith.constant 0 : index
    %116 = vector.load %arg16[%c0_62, %c0_63] : memref<1x32xf32, #tpu.memory_space<vmem>>, vector<1x32xf32>
    %117 = vector.broadcast %116 : vector<1x32xf32> to vector<24x32xf32>
    %118 = arith.addf %115, %117 : vector<24x32xf32>
    %119 = vector.extract_strided_slice %108 {offsets = [0, 0], sizes = [8, 32], strides = [1, 1]} : vector<16x32xf32> to vector<8x32xf32>
    %120 = vector.extract_strided_slice %113 {offsets = [0, 0], sizes = [12, 32], strides = [1, 1]} : vector<24x32xf32> to vector<12x32xf32>
    %121 = vector.extract_strided_slice %118 {offsets = [0, 0], sizes = [12, 32], strides = [1, 1]} : vector<24x32xf32> to vector<12x32xf32>
    %c0_64 = arith.constant 0 : index
    %c0_65 = arith.constant 0 : index
    %122 = vector.load %arg17[%c0_64, %c0_65] : memref<32x32xf32, #tpu.memory_space<vmem>>, vector<32x32xf32>
    %c0_66 = arith.constant 0 : index
    %c0_67 = arith.constant 0 : index
    %123 = vector.load %arg18[%c0_66, %c0_67] : memref<1x32xf32, #tpu.memory_space<vmem>>, vector<1x32xf32>
    %124 = vector.shape_cast %119 : vector<8x32xf32> to vector<1x8x32xf32>
    %125 = vector.shape_cast %124 : vector<1x8x32xf32> to vector<1x8x32xf32>
    %126 = vector.broadcast %125 : vector<1x8x32xf32> to vector<4x8x32xf32>
    %127 = vector.broadcast %2 : vector<4x1x32xf32> to vector<4x8x32xf32>
    %128 = arith.mulf %126, %127 : vector<4x8x32xf32>
    %129 = vector.shape_cast %128 : vector<4x8x32xf32> to vector<32x32xf32>
    %cst_68 = arith.constant dense<0.000000e+00> : vector<32x12xf32>
    %130 = tpu.matmul %129, %120, %cst_68 {dimension_numbers = #tpu.dot_dimension_numbers<[1], [1], [0], [0], [0, 0, 1, 0], [], []>} : vector<32x32xf32>, vector<12x32xf32>, vector<32x12xf32> -> vector<32x12xf32>
    %cst_69 = arith.constant dense<0xFF800000> : vector<32xf32>
    %131 = vector.multi_reduction <maximumf>, %130, %cst_69 [1] : vector<32x12xf32> to vector<32xf32>
    %132 = vector.shape_cast %131 : vector<32xf32> to vector<32x1xf32>
    %133 = vector.broadcast %132 : vector<32x1xf32> to vector<32x12xf32>
    %134 = arith.subf %130, %133 : vector<32x12xf32>
    %135 = math.exp %134 : vector<32x12xf32>
    %cst_70 = arith.constant dense<0.000000e+00> : vector<32xf32>
    %136 = vector.multi_reduction <add>, %135, %cst_70 [1] : vector<32x12xf32> to vector<32xf32>
    %137 = vector.shape_cast %136 : vector<32xf32> to vector<32x1xf32>
    %138 = tpu.reciprocal %137 {approx = true} : vector<32x1xf32> -> vector<32x1xf32>
    %139 = vector.broadcast %138 : vector<32x1xf32> to vector<32x12xf32>
    %140 = arith.mulf %135, %139 : vector<32x12xf32>
    %cst_71 = arith.constant dense<0.000000e+00> : vector<32x32xf32>
    %141 = tpu.matmul %140, %121, %cst_71 {dimension_numbers = #tpu.dot_dimension_numbers<[1], [0], [0], [1], [0, 0, 1, 1], [], []>} : vector<32x12xf32>, vector<12x32xf32>, vector<32x32xf32> -> vector<32x32xf32>
    %142 = vector.shape_cast %141 : vector<32x32xf32> to vector<4x8x32xf32>
    %143 = vector.broadcast %2 : vector<4x1x32xf32> to vector<4x8x32xf32>
    %144 = arith.mulf %142, %143 : vector<4x8x32xf32>
    %cst_72 = arith.constant dense<0.000000e+00> : vector<8x32xf32>
    %145 = vector.multi_reduction <add>, %144, %cst_72 [0] : vector<4x8x32xf32> to vector<8x32xf32>
    %cst_73 = arith.constant dense<0.000000e+00> : vector<8x32xf32>
    %146 = tpu.matmul %145, %122, %cst_73 {dimension_numbers = #tpu.dot_dimension_numbers<[1], [0], [0], [1], [0, 0, 1, 1], [], []>} : vector<8x32xf32>, vector<32x32xf32>, vector<8x32xf32> -> vector<8x32xf32>
    %147 = vector.broadcast %123 : vector<1x32xf32> to vector<8x32xf32>
    %148 = arith.addf %146, %147 : vector<8x32xf32>
    %149 = vector.extract_strided_slice %108 {offsets = [8, 0], sizes = [8, 32], strides = [1, 1]} : vector<16x32xf32> to vector<8x32xf32>
    %150 = vector.extract_strided_slice %113 {offsets = [12, 0], sizes = [12, 32], strides = [1, 1]} : vector<24x32xf32> to vector<12x32xf32>
    %151 = vector.extract_strided_slice %118 {offsets = [12, 0], sizes = [12, 32], strides = [1, 1]} : vector<24x32xf32> to vector<12x32xf32>
    %c0_74 = arith.constant 0 : index
    %c0_75 = arith.constant 0 : index
    %152 = vector.load %arg17[%c0_74, %c0_75] : memref<32x32xf32, #tpu.memory_space<vmem>>, vector<32x32xf32>
    %c0_76 = arith.constant 0 : index
    %c0_77 = arith.constant 0 : index
    %153 = vector.load %arg18[%c0_76, %c0_77] : memref<1x32xf32, #tpu.memory_space<vmem>>, vector<1x32xf32>
    %154 = vector.shape_cast %149 : vector<8x32xf32> to vector<1x8x32xf32>
    %155 = vector.shape_cast %154 : vector<1x8x32xf32> to vector<1x8x32xf32>
    %156 = vector.broadcast %155 : vector<1x8x32xf32> to vector<4x8x32xf32>
    %157 = vector.broadcast %2 : vector<4x1x32xf32> to vector<4x8x32xf32>
    %158 = arith.mulf %156, %157 : vector<4x8x32xf32>
    %159 = vector.shape_cast %158 : vector<4x8x32xf32> to vector<32x32xf32>
    %cst_78 = arith.constant dense<0.000000e+00> : vector<32x12xf32>
    %160 = tpu.matmul %159, %150, %cst_78 {dimension_numbers = #tpu.dot_dimension_numbers<[1], [1], [0], [0], [0, 0, 1, 0], [], []>} : vector<32x32xf32>, vector<12x32xf32>, vector<32x12xf32> -> vector<32x12xf32>
    %cst_79 = arith.constant dense<0xFF800000> : vector<32xf32>
    %161 = vector.multi_reduction <maximumf>, %160, %cst_79 [1] : vector<32x12xf32> to vector<32xf32>
    %162 = vector.shape_cast %161 : vector<32xf32> to vector<32x1xf32>
    %163 = vector.broadcast %162 : vector<32x1xf32> to vector<32x12xf32>
    %164 = arith.subf %160, %163 : vector<32x12xf32>
    %165 = math.exp %164 : vector<32x12xf32>
    %cst_80 = arith.constant dense<0.000000e+00> : vector<32xf32>
    %166 = vector.multi_reduction <add>, %165, %cst_80 [1] : vector<32x12xf32> to vector<32xf32>
    %167 = vector.shape_cast %166 : vector<32xf32> to vector<32x1xf32>
    %168 = tpu.reciprocal %167 {approx = true} : vector<32x1xf32> -> vector<32x1xf32>
    %169 = vector.broadcast %168 : vector<32x1xf32> to vector<32x12xf32>
    %170 = arith.mulf %165, %169 : vector<32x12xf32>
    %cst_81 = arith.constant dense<0.000000e+00> : vector<32x32xf32>
    %171 = tpu.matmul %170, %151, %cst_81 {dimension_numbers = #tpu.dot_dimension_numbers<[1], [0], [0], [1], [0, 0, 1, 1], [], []>} : vector<32x12xf32>, vector<12x32xf32>, vector<32x32xf32> -> vector<32x32xf32>
    %172 = vector.shape_cast %171 : vector<32x32xf32> to vector<4x8x32xf32>
    %173 = vector.broadcast %2 : vector<4x1x32xf32> to vector<4x8x32xf32>
    %174 = arith.mulf %172, %173 : vector<4x8x32xf32>
    %cst_82 = arith.constant dense<0.000000e+00> : vector<8x32xf32>
    %175 = vector.multi_reduction <add>, %174, %cst_82 [0] : vector<4x8x32xf32> to vector<8x32xf32>
    %cst_83 = arith.constant dense<0.000000e+00> : vector<8x32xf32>
    %176 = tpu.matmul %175, %152, %cst_83 {dimension_numbers = #tpu.dot_dimension_numbers<[1], [0], [0], [1], [0, 0, 1, 1], [], []>} : vector<8x32xf32>, vector<32x32xf32>, vector<8x32xf32> -> vector<8x32xf32>
    %177 = vector.broadcast %153 : vector<1x32xf32> to vector<8x32xf32>
    %178 = arith.addf %176, %177 : vector<8x32xf32>
    %179 = tpu.concatenate %148, %178 in 0 : vector<8x32xf32>, vector<8x32xf32> -> vector<16x32xf32>
    %180 = arith.addf %103, %179 : vector<16x32xf32>
    %c0_84 = arith.constant 0 : index
    %c0_85 = arith.constant 0 : index
    %181 = vector.load %arg25[%c0_84, %c0_85] : memref<1x32xf32, #tpu.memory_space<vmem>>, vector<1x32xf32>
    %c0_86 = arith.constant 0 : index
    %c0_87 = arith.constant 0 : index
    %182 = vector.load %arg26[%c0_86, %c0_87] : memref<1x32xf32, #tpu.memory_space<vmem>>, vector<1x32xf32>
    %cst_88 = arith.constant dense<0.000000e+00> : vector<16xf32>
    %183 = vector.multi_reduction <add>, %180, %cst_88 [1] : vector<16x32xf32> to vector<16xf32>
    %184 = vector.shape_cast %183 : vector<16xf32> to vector<16x1xf32>
    %cst_89 = arith.constant 3.200000e+01 : f32
    %185 = vector.broadcast %cst_89 : f32 to vector<16x1xf32>
    %186 = arith.divf %184, %185 : vector<16x1xf32>
    %187 = arith.mulf %180, %180 : vector<16x32xf32>
    %cst_90 = arith.constant dense<0.000000e+00> : vector<16xf32>
    %188 = vector.multi_reduction <add>, %187, %cst_90 [1] : vector<16x32xf32> to vector<16xf32>
    %189 = vector.shape_cast %188 : vector<16xf32> to vector<16x1xf32>
    %cst_91 = arith.constant 3.200000e+01 : f32
    %190 = vector.broadcast %cst_91 : f32 to vector<16x1xf32>
    %191 = arith.divf %189, %190 : vector<16x1xf32>
    %192 = arith.mulf %186, %186 : vector<16x1xf32>
    %193 = arith.subf %191, %192 : vector<16x1xf32>
    %194 = vector.broadcast %186 : vector<16x1xf32> to vector<16x32xf32>
    %195 = arith.subf %180, %194 : vector<16x32xf32>
    %cst_92 = arith.constant 9.99999974E-6 : f32
    %196 = vector.broadcast %cst_92 : f32 to vector<16x1xf32>
    %197 = arith.addf %193, %196 : vector<16x1xf32>
    %198 = math.rsqrt %197 : vector<16x1xf32>
    %199 = vector.broadcast %198 : vector<16x1xf32> to vector<16x32xf32>
    %200 = arith.mulf %195, %199 : vector<16x32xf32>
    %201 = vector.broadcast %181 : vector<1x32xf32> to vector<16x32xf32>
    %202 = arith.mulf %200, %201 : vector<16x32xf32>
    %203 = vector.broadcast %182 : vector<1x32xf32> to vector<16x32xf32>
    %204 = arith.addf %202, %203 : vector<16x32xf32>
    %c0_93 = arith.constant 0 : index
    %c0_94 = arith.constant 0 : index
    %205 = vector.load %arg19[%c0_93, %c0_94] : memref<32x64xf32, #tpu.memory_space<vmem>>, vector<32x64xf32>
    %cst_95 = arith.constant dense<0.000000e+00> : vector<16x64xf32>
    %206 = tpu.matmul %204, %205, %cst_95 {dimension_numbers = #tpu.dot_dimension_numbers<[1], [0], [0], [1], [0, 0, 1, 1], [], []>} : vector<16x32xf32>, vector<32x64xf32>, vector<16x64xf32> -> vector<16x64xf32>
    %c0_96 = arith.constant 0 : index
    %c0_97 = arith.constant 0 : index
    %207 = vector.load %arg20[%c0_96, %c0_97] : memref<1x64xf32, #tpu.memory_space<vmem>>, vector<1x64xf32>
    %208 = vector.broadcast %207 : vector<1x64xf32> to vector<16x64xf32>
    %209 = arith.addf %206, %208 : vector<16x64xf32>
    %cst_98 = arith.constant 0.000000e+00 : f32
    %210 = vector.broadcast %cst_98 : f32 to vector<16x64xf32>
    %211 = arith.maximumf %209, %210 : vector<16x64xf32>
    %c0_99 = arith.constant 0 : index
    %c0_100 = arith.constant 0 : index
    %212 = vector.load %arg21[%c0_99, %c0_100] : memref<64x32xf32, #tpu.memory_space<vmem>>, vector<64x32xf32>
    %cst_101 = arith.constant dense<0.000000e+00> : vector<16x32xf32>
    %213 = tpu.matmul %211, %212, %cst_101 {dimension_numbers = #tpu.dot_dimension_numbers<[1], [0], [0], [1], [0, 0, 1, 1], [], []>} : vector<16x64xf32>, vector<64x32xf32>, vector<16x32xf32> -> vector<16x32xf32>
    %c0_102 = arith.constant 0 : index
    %c0_103 = arith.constant 0 : index
    %214 = vector.load %arg22[%c0_102, %c0_103] : memref<1x32xf32, #tpu.memory_space<vmem>>, vector<1x32xf32>
    %215 = vector.broadcast %214 : vector<1x32xf32> to vector<16x32xf32>
    %216 = arith.addf %213, %215 : vector<16x32xf32>
    %217 = arith.addf %204, %216 : vector<16x32xf32>
    %c0_104 = arith.constant 0 : index
    %c0_105 = arith.constant 0 : index
    %218 = vector.load %arg27[%c0_104, %c0_105] : memref<1x32xf32, #tpu.memory_space<vmem>>, vector<1x32xf32>
    %c0_106 = arith.constant 0 : index
    %c0_107 = arith.constant 0 : index
    %219 = vector.load %arg28[%c0_106, %c0_107] : memref<1x32xf32, #tpu.memory_space<vmem>>, vector<1x32xf32>
    %cst_108 = arith.constant dense<0.000000e+00> : vector<16xf32>
    %220 = vector.multi_reduction <add>, %217, %cst_108 [1] : vector<16x32xf32> to vector<16xf32>
    %221 = vector.shape_cast %220 : vector<16xf32> to vector<16x1xf32>
    %cst_109 = arith.constant 3.200000e+01 : f32
    %222 = vector.broadcast %cst_109 : f32 to vector<16x1xf32>
    %223 = arith.divf %221, %222 : vector<16x1xf32>
    %224 = arith.mulf %217, %217 : vector<16x32xf32>
    %cst_110 = arith.constant dense<0.000000e+00> : vector<16xf32>
    %225 = vector.multi_reduction <add>, %224, %cst_110 [1] : vector<16x32xf32> to vector<16xf32>
    %226 = vector.shape_cast %225 : vector<16xf32> to vector<16x1xf32>
    %cst_111 = arith.constant 3.200000e+01 : f32
    %227 = vector.broadcast %cst_111 : f32 to vector<16x1xf32>
    %228 = arith.divf %226, %227 : vector<16x1xf32>
    %229 = arith.mulf %223, %223 : vector<16x1xf32>
    %230 = arith.subf %228, %229 : vector<16x1xf32>
    %231 = vector.broadcast %223 : vector<16x1xf32> to vector<16x32xf32>
    %232 = arith.subf %217, %231 : vector<16x32xf32>
    %cst_112 = arith.constant 9.99999974E-6 : f32
    %233 = vector.broadcast %cst_112 : f32 to vector<16x1xf32>
    %234 = arith.addf %230, %233 : vector<16x1xf32>
    %235 = math.rsqrt %234 : vector<16x1xf32>
    %236 = vector.broadcast %235 : vector<16x1xf32> to vector<16x32xf32>
    %237 = arith.mulf %232, %236 : vector<16x32xf32>
    %238 = vector.broadcast %218 : vector<1x32xf32> to vector<16x32xf32>
    %239 = arith.mulf %237, %238 : vector<16x32xf32>
    %240 = vector.broadcast %219 : vector<1x32xf32> to vector<16x32xf32>
    %241 = arith.addf %239, %240 : vector<16x32xf32>
    %c0_113 = arith.constant 0 : index
    %c0_114 = arith.constant 0 : index
    %c0_115 = arith.constant 0 : index
    %242 = vector.load %arg30[%c0_113, %c0_114, %c0_115] : memref<3x16x32xf32, #tpu.memory_space<vmem>>, vector<1x16x32xf32>
    %243 = vector.shape_cast %242 : vector<1x16x32xf32> to vector<16x32xf32>
    %244 = vector.shape_cast %241 : vector<16x32xf32> to vector<1x16x32xf32>
    tpu.vector_store %arg30[%c0_113, %c0_114, %c0_115], %244 {strides = array<i32>} : memref<3x16x32xf32, #tpu.memory_space<vmem>>, vector<1x16x32xf32>,
    %c1 = arith.constant 1 : index
    %c0_116 = arith.constant 0 : index
    %c0_117 = arith.constant 0 : index
    %245 = vector.load %arg30[%c1, %c0_116, %c0_117] : memref<3x16x32xf32, #tpu.memory_space<vmem>>, vector<1x16x32xf32>
    %246 = vector.shape_cast %245 : vector<1x16x32xf32> to vector<16x32xf32>
    %247 = vector.shape_cast %78 : vector<16x32xf32> to vector<1x16x32xf32>
    tpu.vector_store %arg30[%c1, %c0_116, %c0_117], %247 {strides = array<i32>} : memref<3x16x32xf32, #tpu.memory_space<vmem>>, vector<1x16x32xf32>,
    %c2 = arith.constant 2 : index
    %c0_118 = arith.constant 0 : index
    %c0_119 = arith.constant 0 : index
    %248 = vector.load %arg30[%c2, %c0_118, %c0_119] : memref<3x16x32xf32, #tpu.memory_space<vmem>>, vector<1x16x32xf32>
    %249 = vector.shape_cast %248 : vector<1x16x32xf32> to vector<16x32xf32>
    %250 = vector.shape_cast %179 : vector<16x32xf32> to vector<1x16x32xf32>
    tpu.vector_store %arg30[%c2, %c0_118, %c0_119], %250 {strides = array<i32>} : memref<3x16x32xf32, #tpu.memory_space<vmem>>, vector<1x16x32xf32>,
    return
  }
  func.func @transform_0(%arg0: i32) -> (i32, i32) {
    %c0_i32 = arith.constant 0 : i32
    %c0_i32_0 = arith.constant 0 : i32
    return %arg0, %c0_i32 : i32, i32
  }
  func.func @transform_1(%arg0: i32) -> (i32, i32) {
    %c0_i32 = arith.constant 0 : i32
    %c0_i32_0 = arith.constant 0 : i32
    return %arg0, %c0_i32 : i32, i32
  }
  func.func @transform_2(%arg0: i32) -> (i32, i32) {
    %c0_i32 = arith.constant 0 : i32
    %c0_i32_0 = arith.constant 0 : i32
    %c0_i32_1 = arith.constant 0 : i32
    return %c0_i32, %c0_i32_0 : i32, i32
  }
  func.func @transform_3(%arg0: i32) -> (i32, i32) {
    %c0_i32 = arith.constant 0 : i32
    %c0_i32_0 = arith.constant 0 : i32
    %c0_i32_1 = arith.constant 0 : i32
    return %c0_i32, %c0_i32_0 : i32, i32
  }
  func.func @transform_4(%arg0: i32) -> (i32, i32) {
    %c0_i32 = arith.constant 0 : i32
    %c0_i32_0 = arith.constant 0 : i32
    %c0_i32_1 = arith.constant 0 : i32
    return %c0_i32, %c0_i32_0 : i32, i32
  }
  func.func @transform_5(%arg0: i32) -> (i32, i32) {
    %c0_i32 = arith.constant 0 : i32
    %c0_i32_0 = arith.constant 0 : i32
    %c0_i32_1 = arith.constant 0 : i32
    return %c0_i32, %c0_i32_0 : i32, i32
  }
  func.func @transform_6(%arg0: i32) -> (i32, i32) {
    %c0_i32 = arith.constant 0 : i32
    %c0_i32_0 = arith.constant 0 : i32
    %c0_i32_1 = arith.constant 0 : i32
    return %c0_i32, %c0_i32_0 : i32, i32
  }
  func.func @transform_7(%arg0: i32) -> (i32, i32) {
    %c0_i32 = arith.constant 0 : i32
    %c0_i32_0 = arith.constant 0 : i32
    %c0_i32_1 = arith.constant 0 : i32
    return %c0_i32, %c0_i32_0 : i32, i32
  }
  func.func @transform_8(%arg0: i32) -> (i32, i32) {
    %c0_i32 = arith.constant 0 : i32
    %c0_i32_0 = arith.constant 0 : i32
    %c0_i32_1 = arith.constant 0 : i32
    return %c0_i32, %c0_i32_0 : i32, i32
  }
  func.func @transform_9(%arg0: i32) -> (i32, i32) {
    %c0_i32 = arith.constant 0 : i32
    %c0_i32_0 = arith.constant 0 : i32
    %c0_i32_1 = arith.constant 0 : i32
    return %c0_i32, %c0_i32_0 : i32, i32
  }
  func.func @transform_10(%arg0: i32) -> (i32, i32) {
    %c0_i32 = arith.constant 0 : i32
    %c0_i32_0 = arith.constant 0 : i32
    %c0_i32_1 = arith.constant 0 : i32
    return %c0_i32, %c0_i32_0 : i32, i32
  }
  func.func @transform_11(%arg0: i32) -> (i32, i32) {
    %c0_i32 = arith.constant 0 : i32
    %c0_i32_0 = arith.constant 0 : i32
    %c0_i32_1 = arith.constant 0 : i32
    return %c0_i32, %c0_i32_0 : i32, i32
  }
  func.func @transform_12(%arg0: i32) -> (i32, i32) {
    %c0_i32 = arith.constant 0 : i32
    %c0_i32_0 = arith.constant 0 : i32
    %c0_i32_1 = arith.constant 0 : i32
    return %c0_i32, %c0_i32_0 : i32, i32
  }
  func.func @transform_13(%arg0: i32) -> (i32, i32) {
    %c0_i32 = arith.constant 0 : i32
    %c0_i32_0 = arith.constant 0 : i32
    %c0_i32_1 = arith.constant 0 : i32
    return %c0_i32, %c0_i32_0 : i32, i32
  }
  func.func @transform_14(%arg0: i32) -> (i32, i32) {
    %c0_i32 = arith.constant 0 : i32
    %c0_i32_0 = arith.constant 0 : i32
    %c0_i32_1 = arith.constant 0 : i32
    return %c0_i32, %c0_i32_0 : i32, i32
  }
  func.func @transform_15(%arg0: i32) -> (i32, i32) {
    %c0_i32 = arith.constant 0 : i32
    %c0_i32_0 = arith.constant 0 : i32
    %c0_i32_1 = arith.constant 0 : i32
    return %c0_i32, %c0_i32_0 : i32, i32
  }
  func.func @transform_16(%arg0: i32) -> (i32, i32) {
    %c0_i32 = arith.constant 0 : i32
    %c0_i32_0 = arith.constant 0 : i32
    %c0_i32_1 = arith.constant 0 : i32
    return %c0_i32, %c0_i32_0 : i32, i32
  }
  func.func @transform_17(%arg0: i32) -> (i32, i32) {
    %c0_i32 = arith.constant 0 : i32
    %c0_i32_0 = arith.constant 0 : i32
    %c0_i32_1 = arith.constant 0 : i32
    return %c0_i32, %c0_i32_0 : i32, i32
  }
  func.func @transform_18(%arg0: i32) -> (i32, i32) {
    %c0_i32 = arith.constant 0 : i32
    %c0_i32_0 = arith.constant 0 : i32
    %c0_i32_1 = arith.constant 0 : i32
    return %c0_i32, %c0_i32_0 : i32, i32
  }
  func.func @transform_19(%arg0: i32) -> (i32, i32) {
    %c0_i32 = arith.constant 0 : i32
    %c0_i32_0 = arith.constant 0 : i32
    %c0_i32_1 = arith.constant 0 : i32
    return %c0_i32, %c0_i32_0 : i32, i32
  }
  func.func @transform_20(%arg0: i32) -> (i32, i32) {
    %c0_i32 = arith.constant 0 : i32
    %c0_i32_0 = arith.constant 0 : i32
    %c0_i32_1 = arith.constant 0 : i32
    return %c0_i32, %c0_i32_0 : i32, i32
  }
  func.func @transform_21(%arg0: i32) -> (i32, i32) {
    %c0_i32 = arith.constant 0 : i32
    %c0_i32_0 = arith.constant 0 : i32
    %c0_i32_1 = arith.constant 0 : i32
    return %c0_i32, %c0_i32_0 : i32, i32
  }
  func.func @transform_22(%arg0: i32) -> (i32, i32) {
    %c0_i32 = arith.constant 0 : i32
    %c0_i32_0 = arith.constant 0 : i32
    %c0_i32_1 = arith.constant 0 : i32
    return %c0_i32, %c0_i32_0 : i32, i32
  }
  func.func @transform_23(%arg0: i32) -> (i32, i32) {
    %c0_i32 = arith.constant 0 : i32
    %c0_i32_0 = arith.constant 0 : i32
    %c0_i32_1 = arith.constant 0 : i32
    return %c0_i32, %c0_i32_0 : i32, i32
  }
  func.func @transform_24(%arg0: i32) -> (i32, i32) {
    %c0_i32 = arith.constant 0 : i32
    %c0_i32_0 = arith.constant 0 : i32
    %c0_i32_1 = arith.constant 0 : i32
    return %c0_i32, %c0_i32_0 : i32, i32
  }
  func.func @transform_25(%arg0: i32) -> (i32, i32) {
    %c0_i32 = arith.constant 0 : i32
    %c0_i32_0 = arith.constant 0 : i32
    %c0_i32_1 = arith.constant 0 : i32
    return %c0_i32, %c0_i32_0 : i32, i32
  }
  func.func @transform_26(%arg0: i32) -> (i32, i32) {
    %c0_i32 = arith.constant 0 : i32
    %c0_i32_0 = arith.constant 0 : i32
    %c0_i32_1 = arith.constant 0 : i32
    return %c0_i32, %c0_i32_0 : i32, i32
  }
  func.func @transform_27(%arg0: i32) -> (i32, i32) {
    %c0_i32 = arith.constant 0 : i32
    %c0_i32_0 = arith.constant 0 : i32
    %c0_i32_1 = arith.constant 0 : i32
    return %c0_i32, %c0_i32_0 : i32, i32
  }
  func.func @transform_28(%arg0: i32) -> (i32, i32, i32) {
    %c0_i32 = arith.constant 0 : i32
    %c0_i32_0 = arith.constant 0 : i32
    %c0_i32_1 = arith.constant 0 : i32
    %c0_i32_2 = arith.constant 0 : i32
    return %c0_i32, %c0_i32_0, %c0_i32_1 : i32, i32, i32
  }
  func.func @transform_29(%arg0: i32) -> (i32, i32, i32) {
    %c0_i32 = arith.constant 0 : i32
    %c0_i32_0 = arith.constant 0 : i32
    %c0_i32_1 = arith.constant 0 : i32
    return %c0_i32, %arg0, %c0_i32_0 : i32, i32, i32
  }
}

</mosaic_0001>

<bundles_post_ra>
// kernel: attn_graph_layer_forward.1
= control target key start
LH: loop header
LB: loop body
LE: loop exit
PB: predicated region body
PF: predicated region fallthrough
CT: control target
= control target key end

     0   :  { %s3162_s6 = smov 1   ;;  %s3163_s10 = smov 2   ;;  %s3750_s0 = inlined_call_operand.smem [shape: u32[30], index: -1, kind: input, shape index: {}] }
   0x1   :  { %s3208_s5 = sld [smem:[%s3750_s0]]   ;;  %s3164_s14 = smov 3  }
   0x2   :  { %s3213_s9 = sld [smem:[%s3750_s0 + %s3162_s6]]   ;;  %s3165_s18 = smov 4  }
   0x3   :  { %s3218_s13 = sld [smem:[%s3750_s0 + %s3163_s10]]   ;;  %s3166_s22 = smov 5  }
   0x4   :  { %s3223_s17 = sld [smem:[%s3750_s0 + %s3164_s14]]   ;;  %s3167_s26 = smov 6  }
   0x5   :  { %s3228_s21 = sld [smem:[%s3750_s0 + %s3165_s18]]   ;;  %s3168_s30 = smov 7  }
   0x6   :  { %s3233_s25 = sld [smem:[%s3750_s0 + %s3166_s22]]   ;;  %s3169_s4 = smov 8  }
   0x7   :  { %s3238_s29 = sld [smem:[%s3750_s0 + %s3167_s26]]   ;;  %s3170_s10 = smov 9  }
   0x8   :  { %3755 = sst [smem:[#allocation13_spill]] %s3213_s9  ;;  %s3171_s15 = smov 10  }
   0x9   :  { %s3243_s3 = sld [smem:[%s3750_s0 + %s3168_s30]]   ;;  %s3172_s20 = smov 11  }
   0xa   :  { %s3248_s8 = sld [smem:[%s3750_s0 + %s3169_s4]]   ;;  %s3173_s26 = smov 12  }
   0xb   :  { %s3253_s14 = sld [smem:[%s3750_s0 + %s3170_s10]]   ;;  %s3174_s1 = smov 13  }
   0xc   :  { %s3258_s19 = sld [smem:[%s3750_s0 + %s3171_s15]]   ;;  %s3175_s7 = smov 14  }
   0xd   :  { %s3263_s24 = sld [smem:[%s3750_s0 + %s3172_s20]]   ;;  %s3176_s15 = smov 15  }
   0xe   :  { %s3268_s30 = sld [smem:[%s3750_s0 + %s3173_s26]]   ;;  %s3177_s22 = smov 16  }
   0xf   :  { %s3273_s6 = sld [smem:[%s3750_s0 + %s3174_s1]]   ;;  %s3178_s28 = smov 17  }
  0x10   :  { %s3278_s12 = sld [smem:[%s3750_s0 + %s3175_s7]]   ;;  %s3179_s7 = smov 18  }
  0x11   :  { %s3283_s20 = sld [smem:[%s3750_s0 + %s3176_s15]]   ;;  %s3180_s15 = smov 19  }
  0x12   :  { %3756 = sst [smem:[#allocation14_spill]] %s3258_s19 }
  0x13   :  { %s3288_s27 = sld [smem:[%s3750_s0 + %s3177_s22]]   ;;  %s3181_s22 = smov 20  }
  0x14   :  { %3757 = sst [smem:[#allocation15_spill]] %s3268_s30 }
  0x15   :  { %3758 = sst [smem:[#allocation16_spill]] %s3273_s6 }
  0x16   :  { %3759 = sst [smem:[#allocation17_spill]] %s3278_s12 }
  0x17   :  { %3760 = sst [smem:[#allocation18_spill]] %s3283_s20 }
  0x18   :  { %s3293_s4 = sld [smem:[%s3750_s0 + %s3178_s28]]   ;;  %s3182_s28 = smov 21  }
  0x19   :  { %s3298_s6 = sld [smem:[%s3750_s0 + %s3179_s7]]   ;;  %s3183_s7 = smov 22  }
  0x1a   :  { %s3303_s20 = sld [smem:[%s3750_s0 + %s3180_s15]]   ;;  %s3184_s15 = smov 23  }
  0x1b   :  { %s3308_s12 = sld [smem:[%s3750_s0 + %s3181_s22]]   ;;  %s3185_s22 = smov 24  }
  0x1c   :  { %s3318_s30 = sld [smem:[%s3750_s0 + %s3183_s7]]   ;;  %s3187_s7 = smov 26  }
  0x1d   :  { %s3338_s19 = sld [smem:[%s3750_s0 + %s3187_s7]]  }
  0x1e   :  { %3761 = sst [smem:[#allocation19_spill]] %s3293_s4 }
  0x1f   :  { %s3313_s4 = sld [smem:[%s3750_s0 + %s3182_s28]]   ;;  %s3186_s28 = smov 25  }
  0x20   :  { %3762 = sst [smem:[#allocation20_spill]] %s3303_s20 }
  0x21   :  { %3763 = sst [smem:[#allocation21_spill]] %s3308_s12 }
  0x22   :  { %s3323_s20 = sld [smem:[%s3750_s0 + %s3184_s15]]   ;;  %s3188_s15 = smov 27  }
  0x23   :  { %s3328_s12 = sld [smem:[%s3750_s0 + %s3185_s22]]   ;;  %s3189_s22 = smov 28  }
  0x24   :  { %s3343_s9 = sld [smem:[%s3750_s0 + %s3188_s15]]  }
  0x25   :  { %3764 = sst [smem:[#allocation22_spill]] %s3313_s4 }
  0x26   :  { %s3333_s4 = sld [smem:[%s3750_s0 + %s3186_s28]]   ;;  %s3190_s28 = smov 29  }
  0x29   :  { %3765 = sst [smem:[#allocation23_spill]] %s3328_s12 }
  0x2a   :  { %s3348_s12 = sld [smem:[%s3750_s0 + %s3189_s22]]  }
  0x2c   :  { %3766 = sst [smem:[#allocation24_spill]] %s3333_s4 }
  0x2d   :  { %s3353_s4 = sld [smem:[%s3750_s0 + %s3190_s28]]  }
  0x2e   :  { %64 = vsyncpa [#allocation3], 0 }
  0x2f   :  { %65 = vsyncpa [#allocation5], 0 }
  0x30   :  { %66 = vsyncpa [#allocation8], 0  ;;  %s3191_s7 = smov [#allocation4]   ;;  %s3192_s11 = smov [#allocation7]  }
  0x31   :  { %s95_s10 = sshll.u32 %s3191_s7, 4  ;;  %s128_s15 = sshll.u32 %s3192_s11, 4  ;;  %s96_s10 = int_to_ptr.vmem [resolvable:$true] %s95_s10  ;;  %s129_s15 = int_to_ptr.vmem [resolvable:$true] %s128_s15 }
  0x32   :  { %s3064_s16 = scalar_lea.vmem %s96_s10, 16  ;;  %s3068_s18 = scalar_lea.vmem %s96_s10, 32 }
  0x33   :  { %p3065_p0 = scmp.ne.s32.totalorder %s96_s10, %s3064_s16  ;;  %p3069_p1 = scmp.lt.s32.totalorder %s96_s10, %s96_s10 }
  0x34   :  { %p3070_p2 = scmp.lt.s32.totalorder %s3068_s18, %s3064_s16 }
  0x36   :  { %p3071_p3 = por %p3070_p2, %p3069_p1 }
  0x38   :  { %p3072_p4 = pnand %p3071_p3, %p3065_p0 }
  0x3a   :  { %3075 = shalt.err (!%p3072_p4)
}
  0x3b   :  { %98 = dma.hbm_to_vmem [thread:$0]  %s3243_s3, 16, %s96_s10, [#allocation5]  }
  0x3c   :  { %s3084_s0 = scalar_lea.vmem %s129_s15, 512  ;;  %p3089_p6 = scmp.lt.s32.totalorder %s129_s15, %s129_s15 }
  0x3d   :  { %p3085_p5 = scmp.ne.s32.totalorder %s129_s15, %s3084_s0  ;;  %p3090_p7 = scmp.lt.s32.totalorder %s3084_s0, %s3084_s0 }
  0x3f   :  { %p3091_p8 = por %p3090_p7, %p3089_p6 }
  0x41   :  { %p3092_p9 = pnand %p3091_p8, %p3085_p5 }
  0x43   :  { %3095 = shalt.err (!%p3092_p9)
}
  0x44   :  { %s3193_s22 = smov 128   ;;  %s3194_s23 = smov 8  }
  0x45   :  { %134 = dma.hbm_to_vmem [thread:$0]  %s3288_s27, 512, %s129_s15, [#allocation8], %s3193_s22, %s3193_s22, %s3194_s23  }
  0x46   :  { %s3195_s26 = smov [#allocation2]   ;;  %s3196_s1 = smov [#allocation6]  }
  0x47   :  { %s85_s28 = sshll.u32 %s3195_s26, 4  ;;  %s107_s2 = sshll.u32 %s3196_s1, 4  ;;  %s86_s28 = int_to_ptr.vmem [resolvable:$true] %s85_s28  ;;  %s108_s2 = int_to_ptr.vmem [resolvable:$true] %s107_s2 }
  0x48   :  { %s3104_s3 = scalar_lea.vmem %s86_s28, 16  ;;  %s3108_s7 = scalar_lea.vmem %s86_s28, 32 }
  0x49   :  { %p3105_p10 = scmp.ne.s32.totalorder %s86_s28, %s3104_s3  ;;  %p3109_p11 = scmp.lt.s32.totalorder %s86_s28, %s86_s28 }
  0x4a   :  { %p3110_p12 = scmp.lt.s32.totalorder %s3108_s7, %s3104_s3 }
  0x4c   :  { %p3111_p13 = por %p3110_p12, %p3109_p11 }
  0x4e   :  { %p3112_p0 = pnand %p3111_p13, %p3105_p10 }
  0x50   :  { %3115 = shalt.err (!%p3112_p0)
}
  0x51   :  { %88 = dma.hbm_to_vmem [thread:$0]  %s3238_s29, 16, %s86_s28, [#allocation3]  }
  0x52   :  { %s3124_s10 = scalar_lea.vmem %s108_s2, 16  ;;  %s3128_s11 = scalar_lea.vmem %s108_s2, 32 }
  0x53   :  { %p3125_p1 = scmp.ne.s32.totalorder %s108_s2, %s3124_s10  ;;  %p3129_p2 = scmp.lt.s32.totalorder %s108_s2, %s108_s2 }
  0x54   :  { %p3130_p3 = scmp.lt.s32.totalorder %s3128_s11, %s3124_s10 }
  0x56   :  { %p3131_p4 = por %p3130_p3, %p3129_p2 }
  0x58   :  { %p3132_p5 = pnand %p3131_p4, %p3125_p1 }
  0x5a   :  { %3135 = shalt.err (!%p3132_p5)
}
  0x5b   :  { %110 = dma.hbm_to_vmem [thread:$0]  %s3253_s14, 16, %s108_s2, [#allocation5]  }
  0x5c   :  { %s3197_s27 = smov [#allocation9]  }
  0x5d   :  { %s142_s15 = sshll.u32 %s3197_s27, 4  ;;  %s143_s15 = int_to_ptr.vmem [resolvable:$true] %s142_s15 }
  0x5e   :  { %s3144_s16 = scalar_lea.vmem %s143_s15, 512  ;;  %p3149_p7 = scmp.lt.s32.totalorder %s143_s15, %s143_s15 }
  0x5f   :  { %p3145_p6 = scmp.ne.s32.totalorder %s143_s15, %s3144_s16  ;;  %p3150_p8 = scmp.lt.s32.totalorder %s3144_s16, %s3144_s16 }
  0x61   :  { %p3151_p9 = por %p3150_p8, %p3149_p7 }
  0x63   :  { %p3152_p10 = pnand %p3151_p9, %p3145_p6 }
  0x65   :  { %3155 = shalt.err (!%p3152_p10)
}
  0x66   :  { %148 = dma.hbm_to_vmem [thread:$0]  %s3298_s6, 512, %s143_s15, [#allocation8], %s3193_s22, %s3193_s22, %s3194_s23  }
  0x67   :  { %3156 = dma.done.wait [#allocation3], 16  }
  0x68   :  { %3157 = vsyncadd [#allocation3], 4294967280 }
  0x69   :  { %3158 = dma.done.wait [#allocation5], 32  }
  0x6a   :  { %3159 = vsyncadd [#allocation5], 4294967264 }
  0x6b   :  { %3160 = dma.done.wait [#allocation8], 1024  }
  0x6c   :  { %3161 = vsyncadd [#allocation8], 4294966272  ;;  %vm204_vm0 = vcmask 261120   ;;  %v196_v0 = vld [vmem:[%s3218_s13 + $0x18] sm:$0xff]  ;;  %v195_v1 = vld [vmem:[%s3218_s13 + $0x10] sm:$0xff]  ;;  %v3198_v24 = vmov 0.0  }
  0x6d   :  { %2714 = vmatprep.subr.mxu1 %v196_v0  ;;  %v3369_v2 = vld [vmem:[%s3208_s5] sm:$0xff]  ;;  %v194_v3 = vld [vmem:[%s3218_s13 + $0x8] sm:$0xff]  ;;  %v289_v6 = vld [vmem:[%s3223_s17 + $0x18] sm:$0xff]  ;;  %vm591_vm1 = vcmask 64512   ;;  %vm3199_vm2 = vmmov 0   ;;  %s3772_s29 = sld [smem:[#allocation18_spill]] }
  0x6e   :  { %2715 = vmatpush3.msra.mxu1 %v196_v0  ;;  %2722 = vmatprep.mubr.msk.f32.mxu1 %vm204_vm0, %v3369_v2  ;;  %v193_v4 = vld [vmem:[%s3218_s13] sm:$0xff]  ;;  %v3378_v5 = vld [vmem:[%s3208_s5 + $0x8] sm:$0xff]  ;;  %v288_v7 = vld [vmem:[%s3223_s17 + $0x10] sm:$0xff]  ;;  %s3767_s5 = sld [smem:[#allocation13_spill]]  ;;  %vm1655_vm3 = vcmask 1043456   ;;  %vm1598_vm4 = vcmask 97280  }
  0x6f   :  { %2716 = vmatprep.subr.mxu1 %v195_v1  ;;  %2744 = vmatprep.mubr.msk.f32.mxu0 %vm204_vm0, %v3369_v2  ;;  %v287_v8 = vld [vmem:[%s3223_s17 + $0x8] sm:$0xff]  ;;  %v286_v9 = vld [vmem:[%s3223_s17] sm:$0xff]  ;;  %v3409_v25 = vld [vmem:[%s3248_s8 + $0x18] sm:$0xff]  ;;  %s3768_s13 = sld [smem:[#allocation14_spill]]  ;;  %vm2334_vm5 = vcmask 523264  }
  0x70   :  { %2717 = vmatpush3.msra.mxu1 %v195_v1  ;;  %v2510_v10 = vld [vmem:[%s3233_s25] ss:$0 sm:$0xff]  ;;  %v3399_v21 = vld [vmem:[%s3348_s12 + $0x1] ss:$0 sm:$0xff]  ;;  %v3403_v22 = vld [vmem:[%s3348_s12 + $0x2] ss:$0 sm:$0xff] }
  0x71   :  { %2718 = vmatprep.subr.mxu1 %v194_v3  ;;  %v3394_v14 = vld [vmem:[%s3348_s12] ss:$0 sm:$0xff]  ;;  %v3413_v27 = vld [vmem:[%s3348_s12 + $0x3] ss:$0 sm:$0xff]  ;;  %v3417_v28 = vld [vmem:[%s3248_s8 + $0x10] sm:$0xff]  ;;  %s3769_s17 = sld [smem:[#allocation15_spill]] }
  0x72   :  { %2719 = vmatpush3.msra.mxu1 %v194_v3  ;;  %v2513_v18 = vld [vmem:[#allocation2] ss:$0 sm:$0xff]  ;;  %v3424_v30 = vld [vmem:[%s3248_s8 + $0x8] sm:$0xff]  ;;  %v375_v33 = vld [vmem:[%s3228_s21 + $0x18] sm:$0xff]  ;;  %s3771_s25 = sld [smem:[#allocation16_spill]] }
  0x73   :  { %2720 = vmatprep.subr.mxu1 %v193_v4  ;;  %v3430_v31 = vld [vmem:[%s3248_s8] sm:$0xff]  ;;  %v374_v34 = vld [vmem:[%s3228_s21 + $0x10] sm:$0xff]  ;;  %2736 = vmatprep.subr.mxu0 %v375_v33  ;;  %v373_v35 = vld [vmem:[%s3228_s21 + $0x8] sm:$0xff]  ;;  %s3773_s8 = sld [smem:[#allocation19_spill]] }
  0x74   :  { %2721 = vmatpush3.msra.mxu1 %v193_v4  ;;  %2737 = vmatpush3.msra.mxu0 %v375_v33  ;;  %v372_v36 = vld [vmem:[%s3228_s21] sm:$0xff]  ;;  %s3770_s21 = sld [smem:[#allocation17_spill]] }
  0x75   :  { %2723 = vmatmul.mubr.msk.f32.vlgmr.msra.gmra.mxu1 %vm204_vm0, %v3378_v5  ;;  %2725 = vmatprep.subr.mxu1 %v289_v6  ;;  %v2516_v3 = vld [vmem:[#allocation4] ss:$0 sm:$0xff]  ;;  %s3774_s14 = sld [smem:[#allocation23_spill]] }
  0x76   :  { %2726 = vmatpush3.msra.mxu1 %v289_v6  ;;  %2733 = vmatprep.mubr.msk.f32.mxu1 %vm204_vm0, %v3369_v2  ;;  %s3777_s6 = sld [smem:[#allocation20_spill]] }
  0x77   :  { %2727 = vmatprep.subr.mxu1 %v288_v7  ;;  %2738 = vmatprep.subr.mxu0 %v374_v34 }
  0x78   :  { %2728 = vmatpush3.msra.mxu1 %v288_v7  ;;  %2739 = vmatpush3.msra.mxu0 %v374_v34 }
  0x79   :  { %2729 = vmatprep.subr.mxu1 %v287_v8  ;;  %2740 = vmatprep.subr.mxu0 %v373_v35 }
  0x7a   :  { %2730 = vmatpush3.msra.mxu1 %v287_v8  ;;  %2741 = vmatpush3.msra.mxu0 %v373_v35 }
  0x7b   :  { %2731 = vmatprep.subr.mxu1 %v286_v9  ;;  %2742 = vmatprep.subr.mxu0 %v372_v36 }
  0x7c   :  { %2732 = vmatpush3.msra.mxu1 %v286_v9  ;;  %2743 = vmatpush3.msra.mxu0 %v372_v36 }
  0x7d   :  { %2734 = vmatmul.mubr.msk.f32.vlgmr.msra.gmra.mxu1 %vm204_vm0, %v3378_v5  ;;  %2745 = vmatmul.mubr.msk.f32.vlgmr.msra.gmra.mxu0 %vm204_vm0, %v3378_v5 }
 0x135   :  { %v2724_v11 = vpop.f32.mrf.mxu1 }
 0x136   :  { %v3391_v12 = vadd.f32 %v2724_v11, %v2510_v10 }
 0x137   :  { %v277_v13 = vpop.f32.mrf.mxu1 }
 0x138   :  { %v278_v15 = vadd.f32 %v2510_v10, %v277_v13 }
 0x13a   :  { %v487_v16 = vmul.f32 %v3394_v14, %v278_v15  ;;  %v488_v23 = vmul.f32 %v3399_v21, %v278_v15  ;;  %v489_v26 = vmul.f32 %v3403_v22, %v278_v15  ;;  %v490_v29 = vmul.f32 %v3413_v27, %v278_v15 }
 0x13c   :  { %2749 = vmatprep.mubr.msk.f32.mxu1 %vm204_vm0, %v487_v16 }
 0x13d   :  { %v2735_v17 = vpop.f32.mrf.mxu1  ;;  %v2746_v1 = vpop.f32.mrf.mxu0 }
 0x13e   :  { %v3433_v32 = vadd.f32 %v2735_v17, %v2513_v18  ;;  %v455_v6 = vadd.f32 %v2746_v1, %v2516_v3 }
 0x13f   :  { %v363_v19 = vpop.f32.mrf.mxu1  ;;  %v449_v4 = vpop.f32.mrf.mxu0 }
 0x140   :  { %v364_v20 = vadd.f32 %v2513_v18, %v363_v19  ;;  %v450_v7 = vadd.f32 %v2516_v3, %v449_v4 }
 0x142   :  { %2747 = vmatprep.subr.msk.mxu1 %vm204_vm0, %v364_v20  ;;  %2755 = vmatprep.subr.mxu0 %v450_v7 }
 0x143   :  { %2748 = vmatpush3.xpose.msk.msra.mxu1 %vm204_vm0, %v364_v20  ;;  %2756 = vmatpush3.msra.mxu0 %v450_v7 }
 0x144   :  { %2763 = vmatprep.subr.mxu1 %v3198_v24  ;;  %2782 = vmatprep.subr.mxu0 %v455_v6 }
 0x146   :  { %2750 = vmatmul.mubr.msk.f32.vlgmr.msra.gmra.mxu1 %vm204_vm0, %v488_v23 }
 0x147   :  { %2752 = vmatprep.mubr.msk.f32.mxu1 %vm204_vm0, %v489_v26  ;;  %2764 = vmatpush3.msra.mxu1 %v3409_v25 }
 0x148   :  { %2765 = vmatprep.subr.mxu1 %v3198_v24 }
 0x149   :  { %2766 = vmatpush3.msra.mxu1 %v3417_v28 }
 0x14a   :  { %2753 = vmatmul.mubr.msk.f32.gmra.mxu1 %vm204_vm0, %v490_v29  ;;  %2767 = vmatprep.subr.mxu1 %v3198_v24 }
 0x14b   :  { %2768 = vmatpush3.msra.mxu1 %v3424_v30  ;;  %2771 = vmatprep.mubr.msk.f32.mxu1 %vm3199_vm2, %v3198_v24 }
 0x14c   :  { %2769 = vmatprep.subr.mxu1 %v3198_v24 }
 0x14d   :  { %2770 = vmatpush3.msra.mxu1 %v3430_v31 }
 0x14e   :  { %2774 = vmatprep.subr.msk.mxu1 %vm204_vm0, %v3433_v32 }
 0x206   :  { %v2751_v37 = vpop.f32.mrf.mxu1 }
 0x207   :  { %v595_v42 = vsel %vm591_vm1, %v2751_v37, -inf }
 0x208   :  { %v572_v38 = vpop.f32.mrf.mxu1 }
 0x209   :  { %v592_v39 = vsel %vm591_vm1, %v572_v38, -inf }
 0x20a   :  { %593 = vmax.xlane.f32.xlu0 %v592_v39  ;;  %v2754_v40 = vpop.f32.mrf.mxu1 }
 0x20b   :  { %v601_v44 = vsel %vm591_vm1, %v2754_v40, -inf }
 0x20c   :  { %v582_v41 = vpop.f32.mrf.mxu1 }
 0x20d   :  { %v598_v43 = vsel %vm591_vm1, %v582_v41, -inf }
 0x20e   :  { %596 = vmax.xlane.f32.xlu0 %v595_v42  ;;  %599 = vmax.xlane.f32.xlu1 %v598_v43 }
 0x212   :  { %602 = vmax.xlane.f32.xlu1 %v601_v44 }
 0x293   :  { %v594_v45 = vpop.xlane.xlu0 %593 }
 0x294   :  { %v604_v46 = vsub.f32 %v572_v38, %v594_v45 }
 0x296   :  { %v608_v47 = vmul.f32 1.442695, %v604_v46  ;;  %v823_v46 = vmul.f32 %v3394_v14, %v3391_v12 }
 0x297   :  { %v597_v48 = vpop.xlane.xlu0 %596  ;;  %v600_v49 = vpop.xlane.xlu1 %599 }
 0x298   :  { %2976 = vpow2.f32 %v608_v47  ;;  %v605_v50 = vsub.f32 %v2751_v37, %v597_v48  ;;  %v606_v51 = vsub.f32 %v582_v41, %v600_v49  ;;  %v824_v47 = vmul.f32 %v3399_v21, %v3391_v12 }
 0x299   :  { %v825_v48 = vmul.f32 %v3403_v22, %v3391_v12 }
 0x29a   :  { %v610_v52 = vmul.f32 1.442695, %v605_v50  ;;  %v612_v53 = vmul.f32 1.442695, %v606_v51 }
 0x29b   :  { %v603_v54 = vpop.xlane.xlu1 %602 }
 0x29c   :  { %2978 = vpow2.f32 %v610_v52  ;;  %v607_v55 = vsub.f32 %v2754_v40, %v603_v54 }
 0x29d   :  { %2980 = vpow2.f32 %v612_v53 }
 0x29e   :  { %v614_v56 = vmul.f32 1.442695, %v607_v55 }
 0x2a0   :  { %2982 = vpow2.f32 %v614_v56 }
 0x2a5   :  { %v2977_v57 = vpop.eup %2976 }
 0x2a6   :  { %v616_v58 = vsel %vm591_vm1, %v2977_v57, 0.0 }
 0x2a7   :  { %617 = vadd.xlane.f32.xlu0 %v616_v58 }
 0x2a9   :  { %v2979_v59 = vpop.eup %2978 }
 0x2aa   :  { %v2981_v60 = vpop.eup %2980  ;;  %v619_v61 = vsel %vm591_vm1, %v2979_v59, 0.0 }
 0x2ab   :  { %620 = vadd.xlane.f32.xlu1 %v619_v61  ;;  %v622_v62 = vsel %vm591_vm1, %v2981_v60, 0.0 }
 0x2ac   :  { %623 = vadd.xlane.f32.xlu0 %v622_v62 }
 0x2ad   :  { %v2983_v63 = vpop.eup %2982 }
 0x2ae   :  { %v625_v0 = vsel %vm591_vm1, %v2983_v63, 0.0 }
 0x2af   :  { %626 = vadd.xlane.f32.xlu1 %v625_v0 }
 0x330   :  { %v618_v8 = vpop.xlane.xlu0 %617 }
 0x331   :  { %2984 = vrcp.f32 %v618_v8 }
 0x334   :  { %v621_v9 = vpop.xlane.xlu1 %620 }
 0x335   :  { %v624_v10 = vpop.xlane.xlu0 %623  ;;  %2986 = vrcp.f32 %v621_v9 }
 0x336   :  { %2988 = vrcp.f32 %v624_v10 }
 0x338   :  { %v627_v11 = vpop.xlane.xlu1 %626 }
 0x339   :  { %2990 = vrcp.f32 %v627_v11 }
 0x33e   :  { %v2985_v13 = vpop.eup %2984 }
 0x33f   :  { %v632_v15 = vmul.f32 %v2985_v13, %v2977_v57 }
 0x341   :  { %2757 = vmatprep.mubr.msk.f32.mxu0 %vm591_vm1, %v632_v15 }
 0x342   :  { %v2987_v16 = vpop.eup %2986 }
 0x343   :  { %v2989_v17 = vpop.eup %2988  ;;  %v633_v18 = vmul.f32 %v2987_v16, %v2979_v59 }
 0x344   :  { %v634_v19 = vmul.f32 %v2989_v17, %v2981_v60 }
 0x345   :  { %2758 = vmatmul.mubr.msk.f32.vlgmr.msra.gmra.mxu0 %vm591_vm1, %v633_v18 }
 0x346   :  { %v2991_v20 = vpop.eup %2990  ;;  %2783 = vmatpush3.msra.mxu0 %v455_v6  ;;  %2760 = vmatprep.mubr.msk.f32.mxu0 %vm591_vm1, %v634_v19 }
 0x347   :  { %v635_v23 = vmul.f32 %v2991_v20, %v2983_v63 }
 0x349   :  { %2761 = vmatmul.mubr.msk.f32.gmra.mxu0 %vm591_vm1, %v635_v23 }
 0x405   :  { %v2759_v26 = vpop.f32.mrf.mxu0 }
 0x406   :  { %v734_v33 = vmul.f32 %v2759_v26, %v3399_v21 }
 0x407   :  { %v714_v29 = vpop.f32.mrf.mxu0 }
 0x408   :  { %v733_v34 = vmul.f32 %v3394_v14, %v714_v29  ;;  %v738_v38 = vsel %vm204_vm0, %v734_v33, 0.0 }
 0x409   :  { %v2762_v35 = vpop.f32.mrf.mxu0 }
 0x40a   :  { %v737_v36 = vsel %vm204_vm0, %v733_v34, 0.0  ;;  %v736_v39 = vmul.f32 %v2762_v35, %v3413_v27 }
 0x40b   :  { %v724_v37 = vpop.f32.mrf.mxu0  ;;  %v739_v41 = vadd.f32 %v738_v38, %v737_v36 }
 0x40c   :  { %v735_v40 = vmul.f32 %v3403_v22, %v724_v37  ;;  %v742_v44 = vsel %vm204_vm0, %v736_v39, 0.0 }
 0x40e   :  { %v740_v42 = vsel %vm204_vm0, %v735_v40, 0.0 }
 0x40f   :  { %v741_v43 = vadd.f32 %v740_v42, %v739_v41 }
 0x411   :  { %v743_v45 = vadd.f32 %v742_v44, %v741_v43 }
 0x413   :  { %2772 = vmatmul.mubr.msk.f32.vlgmr.msra.gmra.mxu1 %vm204_vm0, %v743_v45 }
 0x414   :  { %2775 = vmatpush3.xpose.msk.msra.mxu1 %vm204_vm0, %v3433_v32  ;;  %2776 = vmatprep.mubr.msk.f32.mxu1 %vm204_vm0, %v823_v46  ;;  %v826_v32 = vmul.f32 %v3413_v27, %v3391_v12  ;;  %v3493_v12 = vld [vmem:[#allocation6] ss:$0 sm:$0xff] }
 0x415   :  { %2790 = vmatprep.subr.mxu1 %v3198_v24 }
 0x417   :  { %2777 = vmatmul.mubr.msk.f32.vlgmr.msra.gmra.mxu1 %vm204_vm0, %v824_v47 }
 0x418   :  { %2779 = vmatprep.mubr.msk.f32.mxu1 %vm204_vm0, %v825_v48  ;;  %2791 = vmatpush3.msra.mxu1 %v3409_v25 }
 0x419   :  { %2792 = vmatprep.subr.mxu1 %v3198_v24 }
 0x41a   :  { %2793 = vmatpush3.msra.mxu1 %v3417_v28 }
 0x41b   :  { %2780 = vmatmul.mubr.msk.f32.gmra.mxu1 %vm204_vm0, %v826_v32  ;;  %2794 = vmatprep.subr.mxu1 %v3198_v24  ;;  %v3514_v32 = vld [vmem:[%s3318_s30] ss:$0 sm:$0xff]  ;;  %s3776_s30 = sld [smem:[#allocation21_spill]] }
 0x41c   :  { %2795 = vmatpush3.msra.mxu1 %v3424_v30  ;;  %2798 = vmatprep.mubr.msk.f32.mxu1 %vm3199_vm2, %v3198_v24 }
 0x41d   :  { %2796 = vmatprep.subr.mxu1 %v3198_v24 }
 0x41e   :  { %2797 = vmatpush3.msra.mxu1 %v3430_v31 }
 0x41f   :  { %2812 = vmatprep.subr.mxu1 %v3198_v24 }
 0x4d3   :  { %v819_v25 = vpop.f32.mrf.mxu1 }
 0x4d4   :  { %v820_v28 = vadd.f32 %v3493_v12, %v819_v25 }
 0x4d5   :  { %v2773_v49 = vpop.f32.mrf.mxu1 }
 0x4d6   :  { %2592 = vst.msk [vmem:[%s3353_s4 + $0x10] sm:$0xff] %vm204_vm0, %v820_v28  ;;  %v1152_v15 = vadd.f32 %v820_v28, %v3369_v2  ;;  %v3517_v28 = vld [vmem:[%s3323_s20] ss:$0 sm:$0xff] }
 0x4d7   :  { %v2778_v50 = vpop.f32.mrf.mxu1 }
 0x4d8   :  { %v930_v30 = vsel %vm591_vm1, %v2778_v50, -inf  ;;  %v1156_v17 = vsel %vm204_vm0, %v1152_v15, 0.0  ;;  %v1165_v18 = vmul.f32 %v1152_v15, %v1152_v15 }
 0x4d9   :  { %931 = vmax.xlane.f32.xlu1 %v930_v30  ;;  %v908_v51 = vpop.f32.mrf.mxu1 }
 0x4da   :  { %v927_v52 = vsel %vm591_vm1, %v908_v51, -inf  ;;  %v1167_v19 = vsel %vm204_vm0, %v1165_v18, 0.0  ;;  %v1204_v18 = vld [vmem:[%s3768_s13 + $0x8] sm:$0xff] }
 0x4db   :  { %928 = vmax.xlane.f32.xlu0 %v927_v52  ;;  %v2781_v53 = vpop.f32.mrf.mxu1 }
 0x4dc   :  { %v936_v31 = vsel %vm591_vm1, %v2781_v53, -inf }
 0x4dd   :  { %937 = vmax.xlane.f32.xlu1 %v936_v31  ;;  %v918_v54 = vpop.f32.mrf.mxu1 }
 0x4de   :  { %v933_v55 = vsel %vm591_vm1, %v918_v54, -inf }
 0x4df   :  { %934 = vmax.xlane.f32.xlu0 %v933_v55 }
 0x562   :  { %v932_v56 = vpop.xlane.xlu1 %931 }
 0x563   :  { %v940_v57 = vsub.f32 %v2778_v50, %v932_v56 }
 0x564   :  { %v929_v58 = vpop.xlane.xlu0 %928 }
 0x565   :  { %v945_v59 = vmul.f32 1.442695, %v940_v57  ;;  %v939_v60 = vsub.f32 %v908_v51, %v929_v58 }
 0x566   :  { %v938_v61 = vpop.xlane.xlu1 %937 }
 0x567   :  { %2992 = vpow2.f32 %v945_v59  ;;  %v943_v62 = vmul.f32 1.442695, %v939_v60  ;;  %v942_v63 = vsub.f32 %v2781_v53, %v938_v61 }
 0x568   :  { %v935_v0 = vpop.xlane.xlu0 %934 }
 0x569   :  { %2994 = vpow2.f32 %v943_v62  ;;  %v949_v1 = vmul.f32 1.442695, %v942_v63  ;;  %v941_v3 = vsub.f32 %v918_v54, %v935_v0 }
 0x56b   :  { %2996 = vpow2.f32 %v949_v1  ;;  %v947_v4 = vmul.f32 1.442695, %v941_v3 }
 0x56d   :  { %2998 = vpow2.f32 %v947_v4 }
 0x574   :  { %v2993_v6 = vpop.eup %2992 }
 0x575   :  { %v954_v7 = vsel %vm591_vm1, %v2993_v6, 0.0 }
 0x576   :  { %v2995_v8 = vpop.eup %2994  ;;  %955 = vadd.xlane.f32.xlu1 %v954_v7 }
 0x577   :  { %v951_v9 = vsel %vm591_vm1, %v2995_v8, 0.0 }
 0x578   :  { %v2997_v10 = vpop.eup %2996  ;;  %952 = vadd.xlane.f32.xlu0 %v951_v9  ;;  %v1298_v9 = vld [vmem:[%s3263_s24 + $0x18] sm:$0xff] }
 0x579   :  { %v960_v11 = vsel %vm591_vm1, %v2997_v10, 0.0 }
 0x57a   :  { %v2999_v13 = vpop.eup %2998  ;;  %961 = vadd.xlane.f32.xlu1 %v960_v11  ;;  %v186_v11 = vld [vmem:[%s3767_s5] sm:$0xff] }
 0x57b   :  { %v957_v16 = vsel %vm591_vm1, %v2999_v13, 0.0 }
 0x57c   :  { %958 = vadd.xlane.f32.xlu0 %v957_v16  ;;  %v188_v16 = vld [vmem:[%s3767_s5 + $0x10] sm:$0xff] }
 0x580   :  { %1157 = vadd.xlane.f32.xlu0 %v1156_v17  ;;  %v1205_v17 = vld [vmem:[%s3768_s13 + $0x10] sm:$0xff] }
 0x584   :  { %1168 = vadd.xlane.f32.xlu0 %v1167_v19  ;;  %v1203_v19 = vld [vmem:[%s3768_s13] sm:$0xff] }
 0x5ff   :  { %v956_v20 = vpop.xlane.xlu1 %955 }
 0x600   :  { %3000 = vrcp.f32 %v956_v20 }
 0x601   :  { %v953_v23 = vpop.xlane.xlu0 %952 }
 0x602   :  { %3002 = vrcp.f32 %v953_v23 }
 0x603   :  { %v962_v26 = vpop.xlane.xlu1 %961 }
 0x604   :  { %3004 = vrcp.f32 %v962_v26 }
 0x605   :  { %v959_v29 = vpop.xlane.xlu0 %958 }
 0x606   :  { %3006 = vrcp.f32 %v959_v29 }
 0x609   :  { %v1158_v33 = vpop.xlane.xlu0 %1157 }
 0x60a   :  { %v1163_v2 = vmul.f32 0.03125, %v1158_v33 }
 0x60c   :  { %v1175_v36 = vmul.f32 %v1163_v2, %v1163_v2  ;;  %v1179_v47 = vsub.f32 %v1152_v15, %v1163_v2  ;;  %v1206_v15 = vld [vmem:[%s3768_s13 + $0x18] sm:$0xff] }
 0x60d   :  { %v1169_v34 = vpop.xlane.xlu0 %1168  ;;  %v3001_v35 = vpop.eup %3000  ;;  %2801 = vmatprep.subr.mxu0 %v1206_v15 }
 0x60e   :  { %v1173_v37 = vmul.f32 0.03125, %v1169_v34  ;;  %v968_v41 = vmul.f32 %v3001_v35, %v2993_v6 }
 0x60f   :  { %v3003_v38 = vpop.eup %3002 }
 0x610   :  { %v1177_v39 = vsub.f32 %v1173_v37, %v1175_v36  ;;  %v967_v40 = vmul.f32 %v3003_v38, %v2995_v8 }
 0x611   :  { %v3005_v42 = vpop.eup %3004 }
 0x612   :  { %v1181_v43 = vadd.f32 1e-05, %v1177_v39  ;;  %2784 = vmatprep.mubr.msk.f32.mxu0 %vm591_vm1, %v967_v40  ;;  %v970_v46 = vmul.f32 %v3005_v42, %v2997_v10  ;;  %v1295_v10 = vld [vmem:[%s3263_s24] sm:$0xff]  ;;  %v1398_v40 = vld [vmem:[%s3769_s17 + $0x18] sm:$0xff]  ;;  %v1396_v42 = vld [vmem:[%s3769_s17 + $0x8] sm:$0xff] }
 0x613   :  { %v3007_v44 = vpop.eup %3006  ;;  %2785 = vmatmul.mubr.msk.f32.vlgmr.msra.gmra.mxu0 %vm591_vm1, %v968_v41  ;;  %v1397_v41 = vld [vmem:[%s3769_s17 + $0x10] sm:$0xff] }
 0x614   :  { %3008 = vrsqrt.f32 %v1181_v43  ;;  %v969_v45 = vmul.f32 %v3007_v44, %v2999_v13  ;;  %v187_v13 = vld [vmem:[%s3767_s5 + $0x8] sm:$0xff]  ;;  %2802 = vmatpush3.msra.mxu0 %v1206_v15  ;;  %v1395_v43 = vld [vmem:[%s3769_s17] sm:$0xff] }
 0x615   :  { %2803 = vmatprep.subr.mxu0 %v1205_v17 }
 0x616   :  { %2787 = vmatprep.mubr.msk.f32.mxu0 %vm591_vm1, %v969_v45  ;;  %2804 = vmatpush3.msra.mxu0 %v1205_v17  ;;  %v2549_v45 = vld [vmem:[%s3770_s21] ss:$0 sm:$0xff] }
 0x617   :  { %2788 = vmatmul.mubr.msk.f32.gmra.mxu0 %vm591_vm1, %v970_v46  ;;  %2805 = vmatprep.subr.mxu0 %v1204_v18 }
 0x618   :  { %2806 = vmatpush3.msra.mxu0 %v1204_v18 }
 0x619   :  { %2807 = vmatprep.subr.mxu0 %v1203_v19 }
 0x61a   :  { %2808 = vmatpush3.msra.mxu0 %v1203_v19 }
 0x61b   :  { %2829 = vmatprep.subr.mxu0 %v3198_v24 }
 0x621   :  { %v3009_v48 = vpop.eup %3008 }
 0x622   :  { %v1185_v25 = vmul.f32 %v3009_v48, %v1179_v47 }
 0x624   :  { %v1193_v49 = vmul.f32 %v3514_v32, %v1185_v25 }
 0x626   :  { %v3521_v50 = vadd.f32 %v3517_v28, %v1193_v49 }
 0x628   :  { %2809 = vmatprep.mubr.msk.f32.mxu0 %vm204_vm0, %v3521_v50 }
 0x6d3   :  { %v2786_v30 = vpop.f32.mrf.mxu0 }
 0x6d4   :  { %v1069_v52 = vmul.f32 %v2786_v30, %v3399_v21 }
 0x6d5   :  { %v1049_v51 = vpop.f32.mrf.mxu0 }
 0x6d6   :  { %v1068_v53 = vmul.f32 %v3394_v14, %v1049_v51  ;;  %v1073_v56 = vsel %vm204_vm0, %v1069_v52, 0.0  ;;  %v2546_v51 = vld [vmem:[%s3771_s25] ss:$0 sm:$0xff] }
 0x6d7   :  { %v2789_v31 = vpop.f32.mrf.mxu0 }
 0x6d8   :  { %v1072_v54 = vsel %vm204_vm0, %v1068_v53, 0.0  ;;  %v1071_v57 = vmul.f32 %v2789_v31, %v3413_v27 }
 0x6d9   :  { %v1059_v55 = vpop.f32.mrf.mxu0  ;;  %v1074_v59 = vadd.f32 %v1073_v56, %v1072_v54 }
 0x6da   :  { %v1070_v58 = vmul.f32 %v3403_v22, %v1059_v55  ;;  %v1077_v62 = vsel %vm204_vm0, %v1071_v57, 0.0 }
 0x6dc   :  { %v1075_v60 = vsel %vm204_vm0, %v1070_v58, 0.0 }
 0x6dd   :  { %v1076_v61 = vadd.f32 %v1075_v60, %v1074_v59  ;;  %v3607_v60 = vld [vmem:[%s3772_s29] ss:$0 sm:$0xff] }
 0x6df   :  { %v1078_v63 = vadd.f32 %v1077_v62, %v1076_v61 }
 0x6e1   :  { %2799 = vmatmul.mubr.msk.f32.vlgmr.msra.gmra.mxu1 %vm204_vm0, %v1078_v63 }
 0x6e2   :  { %2820 = vmatprep.mubr.msk.f32.mxu1 %vm3199_vm2, %v3198_v24  ;;  %2813 = vmatpush3.msra.mxu1 %v1298_v9 }
 0x6e3   :  { %2814 = vmatprep.subr.mxu1 %v3198_v24 }
 0x7a1   :  { %v1148_v0 = vpop.f32.mrf.mxu1 }
 0x7a2   :  { %v1149_v1 = vadd.f32 %v3493_v12, %v1148_v0  ;;  %v1297_v12 = vld [vmem:[%s3263_s24 + $0x10] sm:$0xff] }
 0x7a3   :  { %v2800_v3 = vpop.f32.mrf.mxu1  ;;  %2815 = vmatpush3.msra.mxu1 %v1297_v12 }
 0x7a4   :  { %v1153_v4 = vadd.f32 %v1149_v1, %v3378_v5  ;;  %2593 = vst.msk [vmem:[%s3353_s4 + $0x18] sm:$0xff] %vm204_vm0, %v1149_v1  ;;  %2816 = vmatprep.subr.mxu1 %v3198_v24  ;;  %v1296_v5 = vld [vmem:[%s3263_s24 + $0x8] sm:$0xff]  ;;  %s3775_s24 = sld [smem:[#allocation24_spill]] }
 0x7a5   :  { %2817 = vmatpush3.msra.mxu1 %v1296_v5 }
 0x7a6   :  { %v1159_v6 = vsel %vm204_vm0, %v1153_v4, 0.0  ;;  %v1166_v7 = vmul.f32 %v1153_v4, %v1153_v4  ;;  %2818 = vmatprep.subr.mxu1 %v3198_v24 }
 0x7a7   :  { %1160 = vadd.xlane.f32.xlu1 %v1159_v6  ;;  %2819 = vmatpush3.msra.mxu1 %v1295_v10 }
 0x7a8   :  { %v1170_v8 = vsel %vm204_vm0, %v1166_v7, 0.0  ;;  %2821 = vmatmul.mubr.msk.f32.vlgmr.msra.gmra.mxu1 %vm204_vm0, %v186_v11 }
 0x7a9   :  { %2823 = vmatprep.mubr.msk.f32.mxu1 %vm3199_vm2, %v3198_v24 }
 0x7ab   :  { %1171 = vadd.xlane.f32.xlu1 %v1170_v8 }
 0x7ac   :  { %2824 = vmatmul.mubr.msk.f32.gmra.mxu1 %vm204_vm0, %v187_v13 }
 0x7ad   :  { %2826 = vmatprep.mubr.msk.f32.mxu1 %vm3199_vm2, %v3198_v24 }
 0x7b0   :  { %2827 = vmatmul.mubr.msk.f32.gmra.mxu1 %vm204_vm0, %v188_v16 }
 0x830   :  { %v1161_v20 = vpop.xlane.xlu1 %1160 }
 0x831   :  { %v1164_v23 = vmul.f32 0.03125, %v1161_v20 }
 0x833   :  { %v1176_v29 = vmul.f32 %v1164_v23, %v1164_v23  ;;  %v1180_v35 = vsub.f32 %v1153_v4, %v1164_v23 }
 0x834   :  { %v1172_v26 = vpop.xlane.xlu1 %1171 }
 0x835   :  { %v1174_v33 = vmul.f32 0.03125, %v1172_v26 }
 0x837   :  { %v1178_v2 = vsub.f32 %v1174_v33, %v1176_v29 }
 0x839   :  { %v1182_v34 = vadd.f32 1e-05, %v1178_v2 }
 0x83b   :  { %3010 = vrsqrt.f32 %v1182_v34 }
 0x848   :  { %v3011_v36 = vpop.eup %3010 }
 0x849   :  { %v1186_v37 = vmul.f32 %v3011_v36, %v1180_v35 }
 0x84b   :  { %v1194_v38 = vmul.f32 %v3514_v32, %v1186_v37 }
 0x84d   :  { %v3566_v39 = vadd.f32 %v3517_v28, %v1194_v38 }
 0x84f   :  { %2810 = vmatmul.mubr.msk.f32.vlgmr.msra.gmra.mxu0 %vm204_vm0, %v3566_v39 }
 0x850   :  { %2830 = vmatpush3.msra.mxu0 %v1398_v40  ;;  %2837 = vmatprep.mubr.msk.f32.mxu0 %vm3199_vm2, %v3198_v24 }
 0x851   :  { %2831 = vmatprep.subr.mxu0 %v3198_v24 }
 0x852   :  { %2832 = vmatpush3.msra.mxu0 %v1397_v41 }
 0x853   :  { %2833 = vmatprep.subr.mxu0 %v3198_v24 }
 0x854   :  { %2834 = vmatpush3.msra.mxu0 %v1396_v42 }
 0x855   :  { %2835 = vmatprep.subr.mxu0 %v3198_v24 }
 0x856   :  { %2836 = vmatpush3.msra.mxu0 %v1395_v43 }
 0x857   :  { %2838 = vmatmul.mubr.msk.f32.vlgmr.msra.gmra.mxu0 %vm204_vm0, %v186_v11 }
 0x858   :  { %2840 = vmatprep.mubr.msk.f32.mxu0 %vm3199_vm2, %v3198_v24 }
 0x85b   :  { %2841 = vmatmul.mubr.msk.f32.gmra.mxu0 %vm204_vm0, %v187_v13 }
 0x85c   :  { %2843 = vmatprep.mubr.msk.f32.mxu0 %vm3199_vm2, %v3198_v24 }
 0x85f   :  { %2844 = vmatmul.mubr.msk.f32.gmra.mxu0 %vm204_vm0, %v188_v16 }
 0x868   :  { %v1381_v44 = vpop.f32.mrf.mxu1 }
 0x869   :  { %v1382_v48 = vadd.f32 %v2549_v45, %v1381_v44  ;;  %v1489_v44 = vld [vmem:[#allocation7 + $0x18] sm:$0xff] }
 0x86a   :  { %v2822_v46 = vpop.f32.mrf.mxu1 }
 0x86b   :  { %v1487_v46 = vld [vmem:[#allocation7 + $0x8] sm:$0xff] }
 0x86c   :  { %v1386_v47 = vpop.f32.mrf.mxu1 }
 0x86d   :  { %v3587_v32 = vadd.f32 %v2549_v45, %v1386_v47 }
 0x86e   :  { %v2825_v25 = vpop.f32.mrf.mxu1 }
 0x86f   :  { %2846 = vmatprep.subr.msk.mxu1 %vm204_vm0, %v3587_v32 }
 0x870   :  { %2847 = vmatpush3.xpose.msk.msra.mxu1 %vm204_vm0, %v3587_v32  ;;  %v1391_v28 = vpop.f32.mrf.mxu1 }
 0x871   :  { %2848 = vmatprep.subr.msk.mxu1 %vm204_vm0, %v1382_v48  ;;  %v1392_v49 = vadd.f32 %v2549_v45, %v1391_v28  ;;  %v1488_v45 = vld [vmem:[#allocation7 + $0x10] sm:$0xff] }
 0x872   :  { %v2828_v30 = vpop.f32.mrf.mxu1 }
 0x873   :  { %v3620_v3 = vrot.slane %v1392_v49, 4 }
 0x874   :  { %2849 = vmatpush3.xpose.msk.msra.mxu1 %vm204_vm0, %v1382_v48 }
 0x875   :  { %2866 = vmatprep.subr.mxu1 %v3198_v24 }
 0x90f   :  { %v2811_v52 = vpop.f32.mrf.mxu0 }
 0x910   :  { %v3597_v53 = vadd.f32 %v2811_v52, %v2546_v51 }
 0x911   :  { %v1286_v31 = vpop.f32.mrf.mxu0 }
 0x912   :  { %v1287_v54 = vadd.f32 %v2546_v51, %v1286_v31  ;;  %v1839_v51 = vrot.slane %v3587_v32, 4  ;;  %v1834_v32 = vmul.f32 %v3394_v14, %v3597_v53 }
 0x914   :  { %v1492_v55 = vmul.f32 %v3399_v21, %v1287_v54  ;;  %v1491_v56 = vmul.f32 %v3394_v14, %v1287_v54  ;;  %v1493_v57 = vmul.f32 %v3403_v22, %v1287_v54  ;;  %v1494_v59 = vmul.f32 %v3413_v27, %v1287_v54 }
 0x916   :  { %2850 = vmatprep.mubr.msk.f32.mxu1 %vm204_vm0, %v1491_v56  ;;  %v1841_v56 = vsel %vm1655_vm3, %v1839_v51, %v3620_v3 }
 0x917   :  { %2851 = vmatmul.mubr.msk.f32.vlgmr.msra.gmra.mxu1 %vm204_vm0, %v1492_v55  ;;  %v1472_v58 = vpop.f32.mrf.mxu0 }
 0x918   :  { %2853 = vmatprep.mubr.msk.f32.mxu1 %vm204_vm0, %v1493_v57  ;;  %v1473_v63 = vadd.f32 %v3607_v60, %v1472_v58  ;;  %2867 = vmatpush3.msra.mxu1 %v1489_v44 }
 0x919   :  { %v2839_v61 = vpop.f32.mrf.mxu0  ;;  %2868 = vmatprep.subr.mxu1 %v3198_v24 }
 0x91a   :  { %2869 = vmatpush3.msra.mxu1 %v1488_v45  ;;  %v1836_v61 = vmul.f32 %v3403_v22, %v3597_v53 }
 0x91b   :  { %2854 = vmatmul.mubr.msk.f32.gmra.mxu1 %vm204_vm0, %v1494_v59  ;;  %v1477_v62 = vpop.f32.mrf.mxu0  ;;  %2870 = vmatprep.subr.mxu1 %v3198_v24  ;;  %v1835_v59 = vmul.f32 %v3399_v21, %v3597_v53 }
 0x91c   :  { %v3612_v0 = vadd.f32 %v3607_v60, %v1477_v62  ;;  %2874 = vmatprep.mubr.msk.f32.mxu1 %vm3199_vm2, %v3198_v24  ;;  %2871 = vmatpush3.msra.mxu1 %v1487_v46  ;;  %v1837_v62 = vmul.f32 %v3413_v27, %v3597_v53 }
 0x91d   :  { %v2842_v1 = vpop.f32.mrf.mxu0  ;;  %2872 = vmatprep.subr.mxu1 %v3198_v24 }
 0x91e   :  { %2856 = vmatprep.subr.msk.mxu0 %vm1655_vm3, %v3612_v0 }
 0x91f   :  { %2857 = vmatpush3.msk.msra.mxu0 %vm1655_vm3, %v3612_v0  ;;  %v1482_v42 = vpop.f32.mrf.mxu0 }
 0x920   :  { %2858 = vmatprep.subr.mxu0 %v1473_v63 }
 0x921   :  { %2859 = vmatpush3.msra.mxu0 %v1473_v63  ;;  %v2845_v43 = vpop.f32.mrf.mxu0  ;;  %v1483_v63 = vadd.f32 %v3607_v60, %v1482_v42 }
 0x922   :  { %2877 = vmatprep.subr.msk.mxu0 %vm204_vm0, %v3620_v3 }
 0x923   :  { %v1989_v1 = vrot.slane %v1483_v63, 4 }
 0x9d7   :  { %v2852_v4 = vpop.f32.mrf.mxu1 }
 0x9d8   :  { %v1602_v6 = vsel %vm1598_vm4, %v2852_v4, -inf }
 0x9d9   :  { %1603 = vmax.xlane.f32.xlu1 %v1602_v6  ;;  %v1579_v7 = vpop.f32.mrf.mxu1 }
 0x9da   :  { %v1599_v8 = vsel %vm1598_vm4, %v1579_v7, -inf }
 0x9db   :  { %1600 = vmax.xlane.f32.xlu0 %v1599_v8  ;;  %v2855_v9 = vpop.f32.mrf.mxu1 }
 0x9dc   :  { %v1608_v12 = vsel %vm1598_vm4, %v2855_v9, -inf }
 0x9dd   :  { %1609 = vmax.xlane.f32.xlu1 %v1608_v12  ;;  %v1589_v5 = vpop.f32.mrf.mxu1 }
 0x9de   :  { %v1605_v10 = vsel %vm1598_vm4, %v1589_v5, -inf }
 0x9df   :  { %1606 = vmax.xlane.f32.xlu0 %v1605_v10 }
 0xa62   :  { %v1604_v11 = vpop.xlane.xlu1 %1603 }
 0xa63   :  { %v1612_v13 = vsub.f32 %v2852_v4, %v1604_v11 }
 0xa64   :  { %v1601_v15 = vpop.xlane.xlu0 %1600 }
 0xa65   :  { %v1617_v16 = vmul.f32 1.442695, %v1612_v13  ;;  %v1611_v17 = vsub.f32 %v1579_v7, %v1601_v15 }
 0xa66   :  { %v1610_v18 = vpop.xlane.xlu1 %1609 }
 0xa67   :  { %3012 = vpow2.f32 %v1617_v16  ;;  %v1615_v19 = vmul.f32 1.442695, %v1611_v17  ;;  %v1614_v20 = vsub.f32 %v2855_v9, %v1610_v18 }
 0xa68   :  { %v1607_v23 = vpop.xlane.xlu0 %1606 }
 0xa69   :  { %3014 = vpow2.f32 %v1615_v19  ;;  %v1621_v26 = vmul.f32 1.442695, %v1614_v20  ;;  %v1613_v29 = vsub.f32 %v1589_v5, %v1607_v23 }
 0xa6b   :  { %3016 = vpow2.f32 %v1621_v26  ;;  %v1619_v33 = vmul.f32 1.442695, %v1613_v29 }
 0xa6d   :  { %3018 = vpow2.f32 %v1619_v33 }
 0xa74   :  { %v3013_v2 = vpop.eup %3012 }
 0xa75   :  { %v1626_v34 = vsel %vm1598_vm4, %v3013_v2, 0.0 }
 0xa76   :  { %v3015_v35 = vpop.eup %3014  ;;  %1627 = vadd.xlane.f32.xlu1 %v1626_v34 }
 0xa77   :  { %v1623_v36 = vsel %vm1598_vm4, %v3015_v35, 0.0 }
 0xa78   :  { %v3017_v37 = vpop.eup %3016  ;;  %1624 = vadd.xlane.f32.xlu0 %v1623_v36 }
 0xa79   :  { %v1632_v38 = vsel %vm1598_vm4, %v3017_v37, 0.0 }
 0xa7a   :  { %v3019_v40 = vpop.eup %3018  ;;  %1633 = vadd.xlane.f32.xlu1 %v1632_v38 }
 0xa7b   :  { %v1629_v41 = vsel %vm1598_vm4, %v3019_v40, 0.0 }
 0xa7c   :  { %1630 = vadd.xlane.f32.xlu0 %v1629_v41 }
 0xaff   :  { %v1628_v47 = vpop.xlane.xlu1 %1627 }
 0xb00   :  { %3020 = vrcp.f32 %v1628_v47 }
 0xb01   :  { %v1625_v48 = vpop.xlane.xlu0 %1624 }
 0xb02   :  { %3022 = vrcp.f32 %v1625_v48 }
 0xb03   :  { %v1634_v25 = vpop.xlane.xlu1 %1633 }
 0xb04   :  { %3024 = vrcp.f32 %v1634_v25 }
 0xb05   :  { %v1631_v28 = vpop.xlane.xlu0 %1630 }
 0xb06   :  { %3026 = vrcp.f32 %v1631_v28 }
 0xb0d   :  { %v3021_v49 = vpop.eup %3020 }
 0xb0e   :  { %v1640_v31 = vmul.f32 %v3021_v49, %v3013_v2  ;;  %v3687_v49 = vld [vmem:[%s3773_s8] ss:$0 sm:$0xff] }
 0xb0f   :  { %v3023_v30 = vpop.eup %3022 }
 0xb10   :  { %v1639_v52 = vmul.f32 %v3023_v30, %v3015_v35 }
 0xb11   :  { %v3025_v54 = vpop.eup %3024 }
 0xb12   :  { %2860 = vmatprep.mubr.msk.f32.mxu0 %vm1598_vm4, %v1639_v52  ;;  %v1642_v58 = vmul.f32 %v3025_v54, %v3017_v37 }
 0xb13   :  { %v3027_v55 = vpop.eup %3026  ;;  %2861 = vmatmul.mubr.msk.f32.vlgmr.msra.gmra.mxu0 %vm1598_vm4, %v1640_v31 }
 0xb14   :  { %2878 = vmatpush3.xpose.msk.msra.mxu0 %vm204_vm0, %v3620_v3  ;;  %v1641_v57 = vmul.f32 %v3027_v55, %v3019_v40  ;;  %v1486_v3 = vld [vmem:[#allocation7] sm:$0xff] }
 0xb15   :  { %2879 = vmatprep.subr.msk.mxu0 %vm204_vm0, %v1841_v56  ;;  %2873 = vmatpush3.msra.mxu1 %v1486_v3 }
 0xb16   :  { %2863 = vmatprep.mubr.msk.f32.mxu0 %vm1598_vm4, %v1641_v57  ;;  %2887 = vmatprep.subr.msk.mxu1 %vm1655_vm3, %v1989_v1 }
 0xb17   :  { %2864 = vmatmul.mubr.msk.f32.gmra.mxu0 %vm1598_vm4, %v1642_v58 }
 0xb18   :  { %2880 = vmatpush3.xpose.msk.msra.mxu0 %vm204_vm0, %v1841_v56  ;;  %2881 = vmatprep.mubr.msk.f32.mxu0 %vm204_vm0, %v1834_v32 }
 0xb19   :  { %2897 = vmatprep.subr.mxu0 %v3198_v24 }
 0xb1b   :  { %2882 = vmatmul.mubr.msk.f32.vlgmr.msra.gmra.mxu0 %vm204_vm0, %v1835_v59 }
 0xb1c   :  { %2884 = vmatprep.mubr.msk.f32.mxu0 %vm204_vm0, %v1836_v61  ;;  %2898 = vmatpush3.msra.mxu0 %v1489_v44 }
 0xb1d   :  { %2899 = vmatprep.subr.mxu0 %v3198_v24 }
 0xb1e   :  { %2900 = vmatpush3.msra.mxu0 %v1488_v45 }
 0xb1f   :  { %2885 = vmatmul.mubr.msk.f32.gmra.mxu0 %vm204_vm0, %v1837_v62  ;;  %2901 = vmatprep.subr.mxu0 %v3198_v24 }
 0xb20   :  { %2902 = vmatpush3.msra.mxu0 %v1487_v46  ;;  %2905 = vmatprep.mubr.msk.f32.mxu0 %vm3199_vm2, %v3198_v24 }
 0xb21   :  { %2903 = vmatprep.subr.mxu0 %v3198_v24 }
 0xb22   :  { %2904 = vmatpush3.msra.mxu0 %v1486_v3 }
 0xbd3   :  { %v2862_v53 = vpop.f32.mrf.mxu0 }
 0xbd4   :  { %v1745_v6 = vmul.f32 %v2862_v53, %v3399_v21 }
 0xbd5   :  { %v1725_v4 = vpop.f32.mrf.mxu0 }
 0xbd6   :  { %v1744_v7 = vmul.f32 %v3394_v14, %v1725_v4  ;;  %v1749_v24 = vsel %vm204_vm0, %v1745_v6, 0.0  ;;  %v1988_v14 = vrot.slane %v3612_v0, 4 }
 0xbd7   :  { %v2865_v8 = vpop.f32.mrf.mxu0 }
 0xbd8   :  { %v1748_v9 = vsel %vm204_vm0, %v1744_v7, 0.0  ;;  %v1747_v60 = vmul.f32 %v2865_v8, %v3413_v27  ;;  %v1990_v23 = vsel %vm1655_vm3, %v1988_v14, %v1989_v1 }
 0xbd9   :  { %v1735_v12 = vpop.f32.mrf.mxu0  ;;  %v1750_v10 = vadd.f32 %v1749_v24, %v1748_v9 }
 0xbda   :  { %v1746_v5 = vmul.f32 %v3403_v22, %v1735_v12  ;;  %v1753_v17 = vsel %vm204_vm0, %v1747_v60, 0.0 }
 0xbdb   :  { %v2883_v11 = vpop.f32.mrf.mxu0 }
 0xbdc   :  { %v1751_v13 = vsel %vm204_vm0, %v1746_v5, 0.0  ;;  %v1946_v15 = vsel %vm1598_vm4, %v2883_v11, -inf }
 0xbdd   :  { %v1752_v16 = vadd.f32 %v1751_v13, %v1750_v10  ;;  %1947 = vmax.xlane.f32.xlu1 %v1946_v15  ;;  %v1924_v21 = vpop.f32.mrf.mxu0  ;;  %v3703_v15 = vld [vmem:[%s3775_s24] ss:$0 sm:$0xff] }
 0xbde   :  { %v1943_v18 = vsel %vm1598_vm4, %v1924_v21, -inf }
 0xbdf   :  { %v1754_v19 = vadd.f32 %v1753_v17, %v1752_v16  ;;  %1944 = vmax.xlane.f32.xlu0 %v1943_v18  ;;  %v2886_v27 = vpop.f32.mrf.mxu0  ;;  %v3052_v18 = vld [vmem:[%s3348_s12 + $0x1] ss:$0 sm:$0xff] }
 0xbe0   :  { %v1952_v22 = vsel %vm1598_vm4, %v2886_v27, -inf }
 0xbe1   :  { %1953 = vmax.xlane.f32.xlu1 %v1952_v22  ;;  %2875 = vmatmul.mubr.msk.f32.vlgmr.msra.gmra.mxu1 %vm204_vm0, %v1754_v19  ;;  %v1934_v20 = vpop.f32.mrf.mxu0 }
 0xbe2   :  { %2888 = vmatpush3.msk.msra.mxu1 %vm1655_vm3, %v1989_v1  ;;  %v1949_v26 = vsel %vm1598_vm4, %v1934_v20, -inf }
 0xbe3   :  { %2889 = vmatprep.subr.mxu1 %v1990_v23  ;;  %1950 = vmax.xlane.f32.xlu0 %v1949_v26 }
 0xbe4   :  { %2890 = vmatpush3.msra.mxu1 %v1990_v23 }
 0xc66   :  { %v1948_v0 = vpop.xlane.xlu1 %1947 }
 0xc67   :  { %v1956_v29 = vsub.f32 %v2883_v11, %v1948_v0  ;;  %v3700_v11 = vld [vmem:[%s3774_s14] ss:$0 sm:$0xff] }
 0xc68   :  { %v1945_v33 = vpop.xlane.xlu0 %1944 }
 0xc69   :  { %v1961_v2 = vmul.f32 1.442695, %v1956_v29  ;;  %v1955_v34 = vsub.f32 %v1924_v21, %v1945_v33  ;;  %v3054_v29 = vld [vmem:[%s3348_s12 + $0x3] ss:$0 sm:$0xff] }
 0xc6a   :  { %v1954_v35 = vpop.xlane.xlu1 %1953 }
 0xc6b   :  { %3028 = vpow2.f32 %v1961_v2  ;;  %v1959_v36 = vmul.f32 1.442695, %v1955_v34  ;;  %v1958_v37 = vsub.f32 %v2886_v27, %v1954_v35  ;;  %v3053_v27 = vld [vmem:[%s3348_s12] ss:$0 sm:$0xff]  ;;  %v3055_v2 = vld [vmem:[%s3348_s12 + $0x2] ss:$0 sm:$0xff] }
 0xc6c   :  { %v1951_v38 = vpop.xlane.xlu0 %1950  ;;  %s3778_s12 = sld [smem:[#allocation22_spill]] }
 0xc6d   :  { %3030 = vpow2.f32 %v1959_v36  ;;  %v1965_v40 = vmul.f32 1.442695, %v1958_v37  ;;  %v1957_v41 = vsub.f32 %v1934_v20, %v1951_v38 }
 0xc6f   :  { %3032 = vpow2.f32 %v1965_v40  ;;  %v1963_v42 = vmul.f32 1.442695, %v1957_v41 }
 0xc71   :  { %3034 = vpow2.f32 %v1963_v42 }
 0xc78   :  { %v3029_v43 = vpop.eup %3028 }
 0xc79   :  { %v1970_v44 = vsel %vm1598_vm4, %v3029_v43, 0.0 }
 0xc7a   :  { %v3031_v45 = vpop.eup %3030  ;;  %1971 = vadd.xlane.f32.xlu1 %v1970_v44 }
 0xc7b   :  { %v1967_v46 = vsel %vm1598_vm4, %v3031_v45, 0.0 }
 0xc7c   :  { %v3033_v47 = vpop.eup %3032  ;;  %1968 = vadd.xlane.f32.xlu0 %v1967_v46 }
 0xc7d   :  { %v1976_v48 = vsel %vm1598_vm4, %v3033_v47, 0.0 }
 0xc7e   :  { %v3035_v25 = vpop.eup %3034  ;;  %1977 = vadd.xlane.f32.xlu1 %v1976_v48  ;;  %v2228_v48 = vld [vmem:[#allocation9 + $0x18] sm:$0xff] }
 0xc7f   :  { %v1973_v28 = vsel %vm1598_vm4, %v3035_v25, 0.0  ;;  %2908 = vmatprep.subr.mxu1 %v2228_v48 }
 0xc80   :  { %1974 = vadd.xlane.f32.xlu0 %v1973_v28  ;;  %v2226_v28 = vld [vmem:[#allocation9 + $0x8] sm:$0xff] }
 0xca1   :  { %v1830_v30 = vpop.f32.mrf.mxu1 }
 0xca2   :  { %v1831_v51 = vadd.f32 %v3687_v49, %v1830_v30  ;;  %v2325_v30 = vld [vmem:[%s3776_s30 + $0x30] sm:$0xff] }
 0xca3   :  { %v2876_v52 = vpop.f32.mrf.mxu1 }
 0xca4   :  { %v2175_v31 = vadd.f32 %v1831_v51, %v3521_v50  ;;  %2594 = vst.msk [vmem:[%s3353_s4 + $0x20] sm:$0xff] %vm204_vm0, %v1831_v51  ;;  %v2324_v51 = vld [vmem:[%s3776_s30 + $0x28] sm:$0xff]  ;;  %v2323_v52 = vld [vmem:[%s3776_s30 + $0x20] sm:$0xff] }
 0xca6   :  { %v2179_v54 = vsel %vm204_vm0, %v2175_v31, 0.0  ;;  %v2187_v55 = vmul.f32 %v2175_v31, %v2175_v31 }
 0xca7   :  { %2180 = vadd.xlane.f32.xlu0 %v2179_v54 }
 0xca8   :  { %v2189_v56 = vsel %vm204_vm0, %v2187_v55, 0.0 }
 0xcab   :  { %2190 = vadd.xlane.f32.xlu0 %v2189_v56 }
 0xd03   :  { %v1972_v57 = vpop.xlane.xlu1 %1971 }
 0xd04   :  { %3036 = vrcp.f32 %v1972_v57 }
 0xd05   :  { %v1969_v58 = vpop.xlane.xlu0 %1968 }
 0xd06   :  { %3038 = vrcp.f32 %v1969_v58 }
 0xd07   :  { %v1978_v32 = vpop.xlane.xlu1 %1977 }
 0xd08   :  { %3040 = vrcp.f32 %v1978_v32 }
 0xd09   :  { %v1975_v59 = vpop.xlane.xlu0 %1974 }
 0xd0a   :  { %3042 = vrcp.f32 %v1975_v59 }
 0xd11   :  { %v3037_v61 = vpop.eup %3036 }
 0xd12   :  { %v1984_v63 = vmul.f32 %v3037_v61, %v3029_v43 }
 0xd13   :  { %v3039_v62 = vpop.eup %3038 }
 0xd14   :  { %v1983_v50 = vmul.f32 %v3039_v62, %v3031_v45 }
 0xd15   :  { %v3041_v1 = vpop.eup %3040 }
 0xd16   :  { %2891 = vmatprep.mubr.msk.f32.mxu1 %vm1598_vm4, %v1983_v50  ;;  %v1986_v4 = vmul.f32 %v3041_v1, %v3033_v47  ;;  %v2322_v1 = vld [vmem:[%s3776_s30 + $0x18] sm:$0xff] }
 0xd17   :  { %v3043_v3 = vpop.eup %3042  ;;  %2892 = vmatmul.mubr.msk.f32.vlgmr.msra.gmra.mxu1 %vm1598_vm4, %v1984_v63 }
 0xd18   :  { %v1985_v53 = vmul.f32 %v3043_v3, %v3035_v25  ;;  %2909 = vmatpush3.msra.mxu1 %v2228_v48  ;;  %v2227_v25 = vld [vmem:[#allocation9 + $0x10] sm:$0xff]  ;;  %v2591_v48 = vld [vmem:[%s3343_s9] ss:$0 sm:$0xff] }
 0xd19   :  { %2910 = vmatprep.subr.mxu1 %v2227_v25  ;;  %v2321_v3 = vld [vmem:[%s3776_s30 + $0x10] sm:$0xff] }
 0xd1a   :  { %2894 = vmatprep.mubr.msk.f32.mxu1 %vm1598_vm4, %v1985_v53  ;;  %2911 = vmatpush3.msra.mxu1 %v2227_v25  ;;  %v2320_v53 = vld [vmem:[%s3776_s30 + $0x8] sm:$0xff] }
 0xd1b   :  { %2895 = vmatmul.mubr.msk.f32.gmra.mxu1 %vm1598_vm4, %v1986_v4  ;;  %2912 = vmatprep.subr.mxu1 %v2226_v28  ;;  %v2319_v4 = vld [vmem:[%s3776_s30] sm:$0xff] }
 0xd1c   :  { %2913 = vmatpush3.msra.mxu1 %v2226_v28 }
 0xd30   :  { %v2181_v6 = vpop.xlane.xlu0 %2180 }
 0xd31   :  { %v2185_v7 = vmul.f32 0.03125, %v2181_v6  ;;  %v2584_v6 = vld [vmem:[%s3777_s6] ss:$0 sm:$0xff] }
 0xd33   :  { %v2197_v9 = vmul.f32 %v2185_v7, %v2185_v7  ;;  %v2201_v5 = vsub.f32 %v2175_v31, %v2185_v7 }
 0xd34   :  { %v2191_v8 = vpop.xlane.xlu0 %2190 }
 0xd35   :  { %v2195_v12 = vmul.f32 0.03125, %v2191_v8 }
 0xd37   :  { %v2199_v24 = vsub.f32 %v2195_v12, %v2197_v9 }
 0xd39   :  { %v2203_v60 = vadd.f32 1e-05, %v2199_v24 }
 0xd3b   :  { %3044 = vrsqrt.f32 %v2203_v60 }
 0xd48   :  { %v3045_v10 = vpop.eup %3044 }
 0xd49   :  { %v2207_v13 = vmul.f32 %v3045_v10, %v2201_v5  ;;  %v2587_v5 = vld [vmem:[%s3778_s12] ss:$0 sm:$0xff] }
 0xd4b   :  { %v2215_v16 = vmul.f32 %v3700_v11, %v2207_v13 }
 0xd4d   :  { %v3707_v21 = vadd.f32 %v3703_v15, %v2215_v16 }
 0xd4f   :  { %2916 = vmatprep.mubr.msk.f32.mxu1 %vm204_vm0, %v3707_v21 }
 0xdd7   :  { %v2893_v14 = vpop.f32.mrf.mxu1 }
 0xdd8   :  { %v2092_v19 = vmul.f32 %v3052_v18, %v2893_v14 }
 0xdd9   :  { %v2072_v17 = vpop.f32.mrf.mxu1 }
 0xdda   :  { %v2091_v22 = vmul.f32 %v3053_v27, %v2072_v17  ;;  %v2096_v0 = vsel %vm204_vm0, %v2092_v19, 0.0 }
 0xddb   :  { %v2896_v20 = vpop.f32.mrf.mxu1 }
 0xddc   :  { %v2095_v23 = vsel %vm204_vm0, %v2091_v22, 0.0  ;;  %v2094_v33 = vmul.f32 %v3054_v29, %v2896_v20 }
 0xddd   :  { %v2082_v26 = vpop.f32.mrf.mxu1  ;;  %v2097_v35 = vadd.f32 %v2096_v0, %v2095_v23 }
 0xdde   :  { %v2093_v34 = vmul.f32 %v3055_v2, %v2082_v26  ;;  %v2100_v38 = vsel %vm204_vm0, %v2094_v33, 0.0 }
 0xde0   :  { %v2098_v36 = vsel %vm204_vm0, %v2093_v34, 0.0 }
 0xde1   :  { %v2099_v37 = vadd.f32 %v2098_v36, %v2097_v35 }
 0xde3   :  { %v2101_v40 = vadd.f32 %v2100_v38, %v2099_v37 }
 0xde5   :  { %2906 = vmatmul.mubr.msk.f32.vlgmr.msra.gmra.mxu0 %vm204_vm0, %v2101_v40 }
 0xea5   :  { %v2171_v41 = vpop.f32.mrf.mxu0 }
 0xea6   :  { %v2172_v42 = vadd.f32 %v3687_v49, %v2171_v41  ;;  %v2326_v49 = vld [vmem:[%s3776_s30 + $0x38] sm:$0xff] }
 0xea7   :  { %v2907_v43 = vpop.f32.mrf.mxu0  ;;  %2919 = vmatprep.subr.mxu0 %v2326_v49 }
 0xea8   :  { %v2176_v44 = vadd.f32 %v2172_v42, %v3566_v39  ;;  %2595 = vst.msk [vmem:[%s3353_s4 + $0x28] sm:$0xff] %vm204_vm0, %v2172_v42  ;;  %v2225_v39 = vld [vmem:[#allocation9] sm:$0xff]  ;;  %2920 = vmatpush3.msra.mxu0 %v2326_v49 }
 0xea9   :  { %2914 = vmatprep.subr.mxu1 %v2225_v39  ;;  %2921 = vmatprep.subr.mxu0 %v2325_v30 }
 0xeaa   :  { %v2182_v45 = vsel %vm204_vm0, %v2176_v44, 0.0  ;;  %v2188_v46 = vmul.f32 %v2176_v44, %v2176_v44  ;;  %2915 = vmatpush3.msra.mxu1 %v2225_v39  ;;  %2922 = vmatpush3.msra.mxu0 %v2325_v30 }
 0xeab   :  { %2183 = vadd.xlane.f32.xlu1 %v2182_v45  ;;  %2923 = vmatprep.subr.mxu0 %v2324_v51 }
 0xeac   :  { %v2192_v47 = vsel %vm204_vm0, %v2188_v46, 0.0  ;;  %2924 = vmatpush3.msra.mxu0 %v2324_v51 }
 0xead   :  { %2925 = vmatprep.subr.mxu0 %v2323_v52 }
 0xeae   :  { %2926 = vmatpush3.msra.mxu0 %v2323_v52 }
 0xeaf   :  { %2193 = vadd.xlane.f32.xlu1 %v2192_v47  ;;  %2927 = vmatprep.subr.mxu0 %v2322_v1 }
 0xeb0   :  { %2928 = vmatpush3.msra.mxu0 %v2322_v1 }
 0xeb1   :  { %2929 = vmatprep.subr.mxu0 %v2321_v3 }
 0xeb2   :  { %2930 = vmatpush3.msra.mxu0 %v2321_v3 }
 0xeb3   :  { %2931 = vmatprep.subr.mxu0 %v2320_v53 }
 0xeb4   :  { %2932 = vmatpush3.msra.mxu0 %v2320_v53 }
 0xeb5   :  { %2933 = vmatprep.subr.mxu0 %v2319_v4 }
 0xeb6   :  { %2934 = vmatpush3.msra.mxu0 %v2319_v4 }
 0xf34   :  { %v2184_v31 = vpop.xlane.xlu1 %2183 }
 0xf35   :  { %v2186_v54 = vmul.f32 0.03125, %v2184_v31 }
 0xf37   :  { %v2198_v56 = vmul.f32 %v2186_v54, %v2186_v54  ;;  %v2202_v59 = vsub.f32 %v2176_v44, %v2186_v54  ;;  %v2590_v44 = vld [vmem:[%s3338_s19] ss:$0 sm:$0xff] }
 0xf38   :  { %v2194_v55 = vpop.xlane.xlu1 %2193 }
 0xf39   :  { %v2196_v57 = vmul.f32 0.03125, %v2194_v55 }
 0xf3b   :  { %v2200_v58 = vsub.f32 %v2196_v57, %v2198_v56 }
 0xf3d   :  { %v2204_v32 = vadd.f32 1e-05, %v2200_v58 }
 0xf3f   :  { %3046 = vrsqrt.f32 %v2204_v32 }
 0xf4c   :  { %v3047_v61 = vpop.eup %3046 }
 0xf4d   :  { %v2208_v62 = vmul.f32 %v3047_v61, %v2202_v59 }
 0xf4f   :  { %v2216_v50 = vmul.f32 %v3700_v11, %v2208_v62 }
 0xf51   :  { %v2224_v63 = vadd.f32 %v3703_v15, %v2216_v50 }
 0xf53   :  { %2917 = vmatmul.mubr.msk.f32.vlgmr.msra.gmra.mxu1 %vm204_vm0, %v2224_v63 }
0x1013   :  { %v2918_v7 = vpop.f32.mrf.mxu1 }
0x1014   :  { %v2314_v8 = vadd.f32 %v2918_v7, %v2584_v6 }
0x1015   :  { %v2308_v9 = vpop.f32.mrf.mxu1 }
0x1016   :  { %v2309_v12 = vadd.f32 %v2584_v6, %v2308_v9  ;;  %v2318_v60 = vmax.f32 %v2314_v8, 0.0 }
0x1018   :  { %v2317_v24 = vmax.f32 %v2309_v12, 0.0 }
0x101a   :  { %2935 = vmatprep.mubr.msk.f32.mxu0 %vm2334_vm5, %v2317_v24 }
0x101b   :  { %2936 = vmatmul.mubr.msk.f32.vlgmr.msra.gmra.mxu0 %vm2334_vm5, %v2318_v60 }
0x10db   :  { %v2937_v10 = vpop.f32.mrf.mxu0 }
0x10dc   :  { %v2413_v11 = vadd.f32 %v2937_v10, %v2587_v5 }
0x10dd   :  { %v2407_v13 = vpop.f32.mrf.mxu0 }
0x10de   :  { %v2417_v15 = vadd.f32 %v2413_v11, %v2224_v63  ;;  %v2408_v16 = vadd.f32 %v2587_v5, %v2407_v13 }
0x10e0   :  { %v2416_v14 = vadd.f32 %v2408_v16, %v3707_v21  ;;  %v2423_v17 = vsel %vm204_vm0, %v2417_v15, 0.0  ;;  %v2429_v18 = vmul.f32 %v2417_v15, %v2417_v15 }
0x10e1   :  { %2424 = vadd.xlane.f32.xlu1 %v2423_v17 }
0x10e2   :  { %v2420_v19 = vsel %vm204_vm0, %v2416_v14, 0.0  ;;  %v2428_v27 = vmul.f32 %v2416_v14, %v2416_v14  ;;  %v2433_v22 = vsel %vm204_vm0, %v2429_v18, 0.0 }
0x10e3   :  { %2421 = vadd.xlane.f32.xlu0 %v2420_v19 }
0x10e4   :  { %v2430_v20 = vsel %vm204_vm0, %v2428_v27, 0.0 }
0x10e5   :  { %2434 = vadd.xlane.f32.xlu1 %v2433_v22 }
0x10e7   :  { %2431 = vadd.xlane.f32.xlu0 %v2430_v20 }
0x116a   :  { %v2425_v23 = vpop.xlane.xlu1 %2424 }
0x116b   :  { %v2427_v26 = vmul.f32 0.03125, %v2425_v23 }
0x116c   :  { %v2422_v0 = vpop.xlane.xlu0 %2421 }
0x116d   :  { %v2426_v29 = vmul.f32 0.03125, %v2422_v0  ;;  %v2439_v33 = vmul.f32 %v2427_v26, %v2427_v26  ;;  %v2443_v42 = vsub.f32 %v2417_v15, %v2427_v26 }
0x116e   :  { %v2435_v21 = vpop.xlane.xlu1 %2434 }
0x116f   :  { %v2437_v2 = vmul.f32 0.03125, %v2435_v21  ;;  %v2438_v35 = vmul.f32 %v2426_v29, %v2426_v29  ;;  %v2442_v45 = vsub.f32 %v2416_v14, %v2426_v29 }
0x1170   :  { %v2432_v34 = vpop.xlane.xlu0 %2431 }
0x1171   :  { %v2441_v36 = vsub.f32 %v2437_v2, %v2439_v33  ;;  %v2436_v37 = vmul.f32 0.03125, %v2432_v34 }
0x1173   :  { %v2445_v38 = vadd.f32 1e-05, %v2441_v36  ;;  %v2440_v40 = vsub.f32 %v2436_v37, %v2438_v35 }
0x1175   :  { %3048 = vrsqrt.f32 %v2445_v38  ;;  %v2444_v41 = vadd.f32 1e-05, %v2440_v40 }
0x1177   :  { %3050 = vrsqrt.f32 %v2444_v41 }
0x1182   :  { %v3049_v43 = vpop.eup %3048 }
0x1183   :  { %v2449_v46 = vmul.f32 %v3049_v43, %v2443_v42 }
0x1184   :  { %v3051_v47 = vpop.eup %3050 }
0x1185   :  { %v2457_v25 = vmul.f32 %v2590_v44, %v2449_v46  ;;  %v2448_v28 = vmul.f32 %v3051_v47, %v2442_v45 }
0x1187   :  { %v2465_v39 = vadd.f32 %v2591_v48, %v2457_v25  ;;  %v2456_v49 = vmul.f32 %v2590_v44, %v2448_v28 }
0x1189   :  { %2467 = vst.msk [vmem:[%s3353_s4 + $0x8] sm:$0xff] %vm204_vm0, %v2465_v39  ;;  %v2464_v30 = vadd.f32 %v2591_v48, %v2456_v49 }
0x118b   :  { %2466 = vst.msk [vmem:[%s3353_s4] sm:$0xff] %vm204_vm0, %v2464_v30 }
0x118c   :  { %2478 = vsyncpa [#allocation3], 1 }
0x118d   :  { %2479 = vsyncpa [#allocation5], 1 }
0x118e   :  { %2480 = vsyncpa [#allocation8], 1 }

</bundles_post_ra>
